<compile_context>
chip_gen: v7x
topology: tpu7x:2x2x1
jax: 0.10.0
libtpu: 0.0.40
codegen_flags: <defaults>
</compile_context>

<pallas_src>
import functools

import jax
import jax.numpy as jnp
from jax.experimental import pallas as pl
from jax.experimental.pallas import tpu as pltpu


# Padded (lane-friendly) layout constants.
KPAD = 128         # im2col contraction dim: 9*Cin -> 128
CONV_CPAD = 128    # conv output channels -> 128 (lane-dense stores)
F_PAD = 128        # per-frame feature width -> 128
HS_PAD = 128       # recurrent hidden size -> 128 (whole-vreg gate slices)
CLS_PAD = 128      # classifier width -> 128 (lane-dense final store; sliced outside)
TILE_H = 8         # conv spatial row tile (even, divides H)
VMEM_LIMIT = 32 * 1024 * 1024   # explicit, safe on v5e/v6e (128 MiB) and v7x (64 MiB)


# -----------------------------------------------------------------------------
# Kernels
# -----------------------------------------------------------------------------
def _conv_pool_kernel(x_ref, w_ref, b_ref, o_ref, *, tile_h, w_img, cin):
    """Fused 3x3 conv (pad=1) + bias + ReLU + 2x2 max-pool on one row-tile of a frame.

    x_ref:  (1, H+2, W+2, Cin) padded NHWC frame (resident across the row-tile axis)
    w_ref:  (KPAD, CONV_CPAD) bf16 im2col weights (rows ordered (dy, dx, ci), zero-padded)
    b_ref:  (1, CONV_CPAD) f32 bias
    o_ref:  (1, tile_h//2, W//2, CONV_CPAD) pooled output tile
    """
    kpad = w_ref.shape[0]
    cpad = w_ref.shape[1]
    r = pl.program_id(1)
    row0 = pl.multiple_of(r * tile_h, tile_h)
    xt = x_ref[0, pl.ds(row0, tile_h + 2), :, :]              # (tile_h+2, W+2, Cin)

    # im2col in VMEM: 9 static shifted views, concatenated on the lane dim, then the
    # contraction dim is zero-padded up to KPAD=128 for a clean (128,128)@(128,128) MXU op.
    taps = [xt[dy:dy + tile_h, dx:dx + w_img, :]
            for dy in range(3) for dx in range(3)]            # 9 x (tile_h, W, Cin)
    taps.append(jnp.zeros((tile_h, w_img, kpad - 9 * cin), jnp.float32))
    patch = jnp.concatenate(taps, axis=-1)                    # (tile_h, W, KPAD)
    patch = patch.reshape(tile_h * w_img, kpad)               # (tile_h*W, KPAD)

    acc = jnp.dot(patch.astype(w_ref.dtype), w_ref[...],
                  preferred_element_type=jnp.float32)         # bf16 x bf16 -> f32
    acc = jnp.maximum(acc + b_ref[...], 0.0)                  # bias + ReLU

    # fused 2x2 max-pool in VMEM before the store.
    y = acc.reshape(tile_h, w_img // 2, 2, cpad).max(axis=2)          # pool along W
    y = y.reshape(tile_h // 2, 2, w_img // 2, cpad).max(axis=1)       # pool along H
    o_ref[0] = y


def _linear_kernel(x_ref, w_ref, b_ref, o_ref, *, relu):
    y = jnp.dot(x_ref[...].astype(w_ref.dtype), w_ref[...],
                preferred_element_type=jnp.float32) + b_ref[...]
    o_ref[...] = jnp.maximum(y, 0.0) if relu else y


def _lstm_fc_kernel(x_ref, h0_ref, c0_ref, wih_ref, whh_ref, b_ref,
                    wfc_ref, bfc_ref, o_ref, h_s, c_s, xp_s):
    """Single-layer LSTM over the whole sequence + fc on the last hidden state.

    The input projection for ALL timesteps is computed as one batched matmul before the
    serial loop (perf-review item); gate slices are 128-lane aligned (HS_PAD = 128).
    """
    S, B, F = x_ref.shape
    HS = h_s.shape[-1]

    # Hoisted input projection: (S*B, F) @ (F, 4*HS) once, into VMEM scratch.
    xall = x_ref[...].reshape(S * B, F).astype(wih_ref.dtype)
    xp = jnp.dot(xall, wih_ref[...], preferred_element_type=jnp.float32) + b_ref[...]
    xp_s[...] = xp.reshape(S, B, 4 * HS)

    h_s[...] = h0_ref[0]
    c_s[...] = c0_ref[0]

    def step(t, carry):
        gates = xp_s[t] + jnp.dot(h_s[...], whh_ref[...],
                                  preferred_element_type=jnp.float32)   # (B, 4*HS)
        # PyTorch gate order i, f, g, o; each slice is a whole 128-lane chunk.
        i = jax.nn.sigmoid(gates[:, 0 * HS:1 * HS])
        f = jax.nn.sigmoid(gates[:, 1 * HS:2 * HS])
        g = jnp.tanh(gates[:, 2 * HS:3 * HS])
        o = jax.nn.sigmoid(gates[:, 3 * HS:4 * HS])
        c_new = f * c_s[...] + i * g
        h_s[...] = o * jnp.tanh(c_new)
        c_s[...] = c_new
        return carry

    jax.lax.fori_loop(0, S, step, 0, unroll=True)

    # fc on r_out[-1] (== last hidden state); lane-dense padded output, sliced outside.
    o_ref[...] = jnp.dot(h_s[...], wfc_ref[...],
                         preferred_element_type=jnp.float32) + bfc_ref[...]


# -----------------------------------------------------------------------------
# Pallas wrappers
# -----------------------------------------------------------------------------
def conv_relu_pool(x_pad, w, b, *, tile_h):
    """x_pad: (N, H+2, W+2, Cin) NHWC -> (N, H//2, W//2, CONV_CPAD) pooled activations."""
    N, Hp, Wp, C = x_pad.shape
    H, W = Hp - 2, Wp - 2
    assert H % tile_h == 0 and tile_h % 2 == 0 and W % 2 == 0
    n_tiles = H // tile_h
    kpad, cpad = w.shape
    kernel = functools.partial(_conv_pool_kernel, tile_h=tile_h, w_img=W, cin=C)
    return pl.pallas_call(
        kernel,
        out_shape=jax.ShapeDtypeStruct((N, H // 2, W // 2, cpad), jnp.float32),
        grid=(N, n_tiles),
        in_specs=[
            # full padded frame stays VMEM-resident across the row-tile axis
            pl.BlockSpec((1, Hp, Wp, C), lambda n, r: (n, 0, 0, 0)),
            pl.BlockSpec((kpad, cpad), lambda n, r: (0, 0)),
            pl.BlockSpec((1, cpad), lambda n, r: (0, 0)),
        ],
        out_specs=pl.BlockSpec((1, tile_h // 2, W // 2, cpad),
                               lambda n, r: (n, r, 0, 0)),
        compiler_params=pltpu.CompilerParams(
            dimension_semantics=("parallel", "parallel"),
            vmem_limit_bytes=VMEM_LIMIT),
    )(x_pad, w, b)


def linear(x, w, b, *, relu, tile_n):
    """Row-tiled FC: grid over blocks of N rows, weight block resident."""
    N, K = x.shape
    M = w.shape[1]
    assert N % tile_n == 0
    return pl.pallas_call(
        functools.partial(_linear_kernel, relu=relu),
        out_shape=jax.ShapeDtypeStruct((N, M), jnp.float32),
        grid=(N // tile_n,),
        in_specs=[
            pl.BlockSpec((tile_n, K), lambda i: (i, 0)),
            pl.BlockSpec((K, M), lambda i: (0, 0)),
            pl.BlockSpec((1, M), lambda i: (0, 0)),
        ],
        out_specs=pl.BlockSpec((tile_n, M), lambda i: (i, 0)),
        compiler_params=pltpu.CompilerParams(
            dimension_semantics=("parallel",),
            vmem_limit_bytes=VMEM_LIMIT),
    )(x, w, b)


def lstm_fc(r_in, h0, c0, w_ih, w_hh, b, w_fc, b_fc):
    S, B, F = r_in.shape
    HSp = w_hh.shape[0]
    G = w_ih.shape[1]             # 4 * HS_PAD
    Cp = w_fc.shape[1]
    return pl.pallas_call(
        _lstm_fc_kernel,
        out_shape=jax.ShapeDtypeStruct((B, Cp), jnp.float32),
        grid=(1,),
        in_specs=[
            pl.BlockSpec((S, B, F), lambda i: (0, 0, 0)),
            pl.BlockSpec((1, B, HSp), lambda i: (0, 0, 0)),
            pl.BlockSpec((1, B, HSp), lambda i: (0, 0, 0)),
            pl.BlockSpec((F, G), lambda i: (0, 0)),
            pl.BlockSpec((HSp, G), lambda i: (0, 0)),
            pl.BlockSpec((1, G), lambda i: (0, 0)),
            pl.BlockSpec((HSp, Cp), lambda i: (0, 0)),
            pl.BlockSpec((1, Cp), lambda i: (0, 0)),
        ],
        out_specs=pl.BlockSpec((B, Cp), lambda i: (0, 0)),
        scratch_shapes=[
            pltpu.VMEM((B, HSp), jnp.float32),      # h state
            pltpu.VMEM((B, HSp), jnp.float32),      # c state
            pltpu.VMEM((S, B, G), jnp.float32),     # hoisted input projection
        ],
        compiler_params=pltpu.CompilerParams(
            dimension_semantics=("arbitrary",),
            vmem_limit_bytes=VMEM_LIMIT),
    )(r_in, h0, c0, w_ih, w_hh, b, w_fc, b_fc)


# -----------------------------------------------------------------------------
# Model: parameters + forward
# -----------------------------------------------------------------------------
def init_params(key, *, cin, conv_c, h, w, num_features, hidden, num_classes):
    """Logical params, zero-padded into MXU/lane-friendly kernel layouts.

    Padded conv channels / features / hidden units carry exactly-zero weights, so the
    computed function equals the unpadded (logical) model.
    """
    ks = jax.random.split(key, 8)

    def u(k, shape, fan_in):
        s = 1.0 / jnp.sqrt(jnp.float32(fan_in))
        return jax.random.uniform(k, shape, jnp.float32, -s, s)

    h2, w2 = h // 2, w // 2
    k9 = 9 * cin
    flat_logical = h2 * w2 * conv_c

    conv_w = u(ks[0], (k9, conv_c), k9)
    conv_b = u(ks[1], (conv_c,), k9)
    feat_w = u(ks[2], (flat_logical, num_features), flat_logical)
    feat_b = u(ks[3], (num_features,), flat_logical)
    w_ih = u(ks[4], (num_features, 4 * hidden), hidden)
    w_hh = u(ks[5], (hidden, 4 * hidden), hidden)
    b_lstm = u(ks[6], (4 * hidden,), hidden)         # b_ih + b_hh folded together
    fc1_w = u(ks[7], (hidden, num_classes), hidden)
    fc1_b = jnp.zeros((num_classes,), jnp.float32)

    # ---- zero-pad into kernel layouts --------------------------------------
    conv_w_p = jnp.zeros((KPAD, CONV_CPAD), jnp.float32).at[:k9, :conv_c].set(conv_w)
    conv_b_p = jnp.zeros((1, CONV_CPAD), jnp.float32).at[0, :conv_c].set(conv_b)

    # feature FC consumes the padded pooled tensor (h2, w2, CONV_CPAD) flattened.
    feat_w_p = jnp.zeros((h2, w2, CONV_CPAD, F_PAD), jnp.float32)
    feat_w_p = feat_w_p.at[:, :, :conv_c, :num_features].set(
        feat_w.reshape(h2, w2, conv_c, num_features))
    feat_w_p = feat_w_p.reshape(h2 * w2 * CONV_CPAD, F_PAD)
    feat_b_p = jnp.zeros((1, F_PAD), jnp.float32).at[0, :num_features].set(feat_b)

    def pad_gates_cols(m):          # (rows, 4*hidden) -> (rows, 4*HS_PAD), per-gate
        out = jnp.zeros((m.shape[0], 4 * HS_PAD), jnp.float32)
        for g in range(4):
            out = out.at[:, g * HS_PAD:g * HS_PAD + hidden].set(
                m[:, g * hidden:(g + 1) * hidden])
        return out

    w_ih_p = jnp.zeros((F_PAD, 4 * HS_PAD), jnp.float32)
    w_ih_p = w_ih_p.at[:num_features, :].set(pad_gates_cols(w_ih))
    w_hh_p = jnp.zeros((HS_PAD, 4 * HS_PAD), jnp.float32)
    w_hh_p = w_hh_p.at[:hidden, :].set(pad_gates_cols(w_hh))
    b_lstm_p = pad_gates_cols(b_lstm[None, :])

    fc1_w_p = jnp.zeros((HS_PAD, CLS_PAD), jnp.float32).at[:hidden, :num_classes].set(fc1_w)
    fc1_b_p = jnp.zeros((1, CLS_PAD), jnp.float32).at[0, :num_classes].set(fc1_b)

    return {
        "conv_w": conv_w_p.astype(jnp.bfloat16),   # bf16 operands, f32 accumulation
        "conv_b": conv_b_p,
        "feat_w": feat_w_p.astype(jnp.bfloat16),
        "feat_b": feat_b_p,
        "w_ih": w_ih_p.astype(jnp.bfloat16),
        "w_hh": w_hh_p,                            # small recurrent matmul kept f32
        "b_lstm": b_lstm_p,
        "fc1_w": fc1_w_p,
        "fc1_b": fc1_b_p,
    }


def resnet3d_forward(params, inputs, h0, c0, *, seq_len, num_classes):
    """inputs: (batch, seq, C, H, W) float32 (PyTorch NCHW per frame)."""
    batch = inputs.shape[0]
    C, H, W = inputs.shape[2], inputs.shape[3], inputs.shape[4]
    N = batch * seq_len

    # Single layout pass: reshape to frames + NCHW->NHWC + 1px zero pad.  The 9x im2col
    # inflation and the separate pooling pass are now inside the conv kernel.
    c_in = inputs.reshape(N, C, H, W).transpose(0, 2, 3, 1)        # (N, H, W, C)
    x_pad = jnp.pad(c_in, ((0, 0), (1, 1), (1, 1), (0, 0)))        # (N, H+2, W+2, C)

    # Fused conv3x3 + ReLU + 2x2 max-pool (Pallas, spatially tiled, megacore-parallel).
    pooled = conv_relu_pool(x_pad, params["conv_w"], params["conv_b"], tile_h=TILE_H)
    flat = pooled.reshape(N, -1)                                   # (N, H/2*W/2*CONV_CPAD)

    # "classifier" FC -> per-frame feature vector (row-tiled Pallas matmul).
    c_out = linear(flat, params["feat_w"], params["feat_b"], relu=True,
                   tile_n=min(8, N))                               # (N, F_PAD)

    # Faithful raw reinterpretation into (seq, batch, feat), like the reference's
    # r_out.reshape(80, 2, 200).
    r_in = c_out.reshape(seq_len, batch, F_PAD)

    hidden = h0.shape[-1]
    h0p = jnp.pad(h0, ((0, 0), (0, 0), (0, HS_PAD - hidden)))
    c0p = jnp.pad(c0, ((0, 0), (0, 0), (0, HS_PAD - hidden)))

    # Recurrent temporal aggregation + fc head on the last step (single Pallas kernel).
    logits_pad = lstm_fc(r_in, h0p, c0p,
                         params["w_ih"], params["w_hh"], params["b_lstm"],
                         params["fc1_w"], params["fc1_b"])         # (batch, CLS_PAD)
    return logits_pad[:, :num_classes]


# -----------------------------------------------------------------------------
if __name__ == "__main__":
    # small shapes consistent with the module's forward (scaled down from 3x224x224)
    batch, seq_len = 2, 8
    C, H, W = 3, 16, 16
    conv_c = 8            # logical conv channels (padded to 128 lanes in kernels)
    num_features = 64     # logical per-frame feature width
    hidden = 32           # logical recurrent hidden size
    num_classes = 4       # spec head: nn.Linear(200, 4)
    num_layers = 1

    params = init_params(jax.random.PRNGKey(42), cin=C, conv_c=conv_c, h=H, w=W,
                         num_features=num_features, hidden=hidden,
                         num_classes=num_classes)

    key = jax.random.PRNGKey(0)
    k_x, k_h, k_c = jax.random.split(key, 3)
    inputs = jax.random.normal(k_x, (batch, seq_len, C, H, W), jnp.float32)
    h0 = jax.random.normal(k_h, (num_layers, batch, hidden), jnp.float32)
    c0 = jax.random.normal(k_c, (num_layers, batch, hidden), jnp.float32)

    out = resnet3d_forward(params, inputs, h0, c0,
                           seq_len=seq_len, num_classes=num_classes)
    out = jax.block_until_ready(out)
    assert out.shape == (batch, num_classes) and out.dtype == jnp.float32
    print("KERNEL_OK")
</pallas_src>

<mosaic_0001>
module attributes {stable_mosaic.version = 11 : i64} {
  func.func @_conv_pool_kernel(%arg0: i32, %arg1: i32, %arg2: memref<1x18x18x3xf32, #tpu.memory_space<vmem>>, %arg3: memref<128x128xbf16, #tpu.memory_space<vmem>>, %arg4: memref<1x128xf32, #tpu.memory_space<vmem>>, %arg5: memref<1x4x8x128xf32, #tpu.memory_space<vmem>>) attributes {dimension_semantics = [#tpu.dimension_semantics<parallel>, #tpu.dimension_semantics<parallel>], iteration_bounds = array<i64: 16, 2>, scalar_prefetch = 0 : i64, scratch_operands = 0 : i64, tpu.core_type = #tpu.core_type<tc>, window_params = [{transform_indices = @transform_0, window_bounds = array<i64: 1, 18, 18, 3>}, {pipeline_mode = #tpu.pipeline_mode<synchronous>, transform_indices = @transform_1, window_bounds = array<i64: 128, 128>}, {pipeline_mode = #tpu.pipeline_mode<synchronous>, transform_indices = @transform_2, window_bounds = array<i64: 1, 128>}, {transform_indices = @transform_3, window_bounds = array<i64: 1, 4, 8, 128>}]} {
    %c8_i32 = arith.constant 8 : i32
    %0 = arith.muli %arg1, %c8_i32 : i32
    %1 = tpu.assume_multiple %0, 8 : i32
    %c0 = arith.constant 0 : index
    %2 = arith.index_cast %1 : i32 to index
    %c0_0 = arith.constant 0 : index
    %c0_1 = arith.constant 0 : index
    %3 = vector.load %arg2[%c0, %2, %c0_0, %c0_1] : memref<1x18x18x3xf32, #tpu.memory_space<vmem>>, vector<1x10x18x3xf32>
    %4 = vector.shape_cast %3 : vector<1x10x18x3xf32> to vector<10x18x3xf32>
    %5 = vector.extract_strided_slice %4 {offsets = [0, 0, 0], sizes = [8, 16, 3], strides = [1, 1, 1]} : vector<10x18x3xf32> to vector<8x16x3xf32>
    %6 = vector.extract_strided_slice %4 {offsets = [0, 1, 0], sizes = [8, 16, 3], strides = [1, 1, 1]} : vector<10x18x3xf32> to vector<8x16x3xf32>
    %7 = vector.extract_strided_slice %4 {offsets = [0, 2, 0], sizes = [8, 16, 3], strides = [1, 1, 1]} : vector<10x18x3xf32> to vector<8x16x3xf32>
    %8 = vector.extract_strided_slice %4 {offsets = [1, 0, 0], sizes = [8, 16, 3], strides = [1, 1, 1]} : vector<10x18x3xf32> to vector<8x16x3xf32>
    %9 = vector.extract_strided_slice %4 {offsets = [1, 1, 0], sizes = [8, 16, 3], strides = [1, 1, 1]} : vector<10x18x3xf32> to vector<8x16x3xf32>
    %10 = vector.extract_strided_slice %4 {offsets = [1, 2, 0], sizes = [8, 16, 3], strides = [1, 1, 1]} : vector<10x18x3xf32> to vector<8x16x3xf32>
    %11 = vector.extract_strided_slice %4 {offsets = [2, 0, 0], sizes = [8, 16, 3], strides = [1, 1, 1]} : vector<10x18x3xf32> to vector<8x16x3xf32>
    %12 = vector.extract_strided_slice %4 {offsets = [2, 1, 0], sizes = [8, 16, 3], strides = [1, 1, 1]} : vector<10x18x3xf32> to vector<8x16x3xf32>
    %13 = vector.extract_strided_slice %4 {offsets = [2, 2, 0], sizes = [8, 16, 3], strides = [1, 1, 1]} : vector<10x18x3xf32> to vector<8x16x3xf32>
    %cst = arith.constant 0.000000e+00 : f32
    %14 = vector.broadcast %cst : f32 to vector<8x16x101xf32>
    %15 = tpu.concatenate %5, %6, %7, %8, %9, %10, %11, %12, %13, %14 in 2 : vector<8x16x3xf32>, vector<8x16x3xf32>, vector<8x16x3xf32>, vector<8x16x3xf32>, vector<8x16x3xf32>, vector<8x16x3xf32>, vector<8x16x3xf32>, vector<8x16x3xf32>, vector<8x16x3xf32>, vector<8x16x101xf32> -> vector<8x16x128xf32>
    %16 = vector.shape_cast %15 : vector<8x16x128xf32> to vector<128x128xf32>
    %17 = arith.truncf %16 : vector<128x128xf32> to vector<128x128xbf16>
    %c0_2 = arith.constant 0 : index
    %c0_3 = arith.constant 0 : index
    %18 = vector.load %arg3[%c0_2, %c0_3] : memref<128x128xbf16, #tpu.memory_space<vmem>>, vector<128x128xbf16>
    %cst_4 = arith.constant dense<0.000000e+00> : vector<128x128xf32>
    %19 = tpu.matmul %17, %18, %cst_4 {dimension_numbers = #tpu.dot_dimension_numbers<[1], [0], [0], [1], [0, 0, 1, 1], [], []>} : vector<128x128xbf16>, vector<128x128xbf16>, vector<128x128xf32> -> vector<128x128xf32>
    %c0_5 = arith.constant 0 : index
    %c0_6 = arith.constant 0 : index
    %20 = vector.load %arg4[%c0_5, %c0_6] : memref<1x128xf32, #tpu.memory_space<vmem>>, vector<1x128xf32>
    %21 = vector.broadcast %20 : vector<1x128xf32> to vector<128x128xf32>
    %22 = arith.addf %19, %21 : vector<128x128xf32>
    %cst_7 = arith.constant 0.000000e+00 : f32
    %23 = vector.broadcast %cst_7 : f32 to vector<128x128xf32>
    %24 = arith.maximumf %22, %23 : vector<128x128xf32>
    %25 = vector.shape_cast %24 : vector<128x128xf32> to vector<8x8x2x128xf32>
    %cst_8 = arith.constant dense<0xFF800000> : vector<8x8x128xf32>
    %26 = vector.multi_reduction <maximumf>, %25, %cst_8 [2] : vector<8x8x2x128xf32> to vector<8x8x128xf32>
    %27 = vector.shape_cast %26 : vector<8x8x128xf32> to vector<4x2x8x128xf32>
    %cst_9 = arith.constant dense<0xFF800000> : vector<4x8x128xf32>
    %28 = vector.multi_reduction <maximumf>, %27, %cst_9 [1] : vector<4x2x8x128xf32> to vector<4x8x128xf32>
    %c0_10 = arith.constant 0 : index
    %c0_11 = arith.constant 0 : index
    %c0_12 = arith.constant 0 : index
    %c0_13 = arith.constant 0 : index
    %29 = vector.load %arg5[%c0_10, %c0_11, %c0_12, %c0_13] : memref<1x4x8x128xf32, #tpu.memory_space<vmem>>, vector<1x4x8x128xf32>
    %30 = vector.shape_cast %29 : vector<1x4x8x128xf32> to vector<4x8x128xf32>
    %31 = vector.shape_cast %28 : vector<4x8x128xf32> to vector<1x4x8x128xf32>
    tpu.vector_store %arg5[%c0_10, %c0_11, %c0_12, %c0_13], %31 {strides = array<i32>} : memref<1x4x8x128xf32, #tpu.memory_space<vmem>>, vector<1x4x8x128xf32>,
    return
  }
  func.func @transform_0(%arg0: i32, %arg1: i32) -> (i32, i32, i32, i32) {
    %c0_i32 = arith.constant 0 : i32
    %c0_i32_0 = arith.constant 0 : i32
    %c0_i32_1 = arith.constant 0 : i32
    %c0_i32_2 = arith.constant 0 : i32
    return %arg0, %c0_i32, %c0_i32_0, %c0_i32_1 : i32, i32, i32, i32
  }
  func.func @transform_1(%arg0: i32, %arg1: i32) -> (i32, i32) {
    %c0_i32 = arith.constant 0 : i32
    %c0_i32_0 = arith.constant 0 : i32
    %c0_i32_1 = arith.constant 0 : i32
    return %c0_i32, %c0_i32_0 : i32, i32
  }
  func.func @transform_2(%arg0: i32, %arg1: i32) -> (i32, i32) {
    %c0_i32 = arith.constant 0 : i32
    %c0_i32_0 = arith.constant 0 : i32
    %c0_i32_1 = arith.constant 0 : i32
    return %c0_i32, %c0_i32_0 : i32, i32
  }
  func.func @transform_3(%arg0: i32, %arg1: i32) -> (i32, i32, i32, i32) {
    %c0_i32 = arith.constant 0 : i32
    %c0_i32_0 = arith.constant 0 : i32
    %c0_i32_1 = arith.constant 0 : i32
    return %arg0, %arg1, %c0_i32, %c0_i32_0 : i32, i32, i32, i32
  }
}

</mosaic_0001>

<bundles_post_ra>
// kernel: tpu_custom_call.1
= control target key start
LH: loop header
LB: loop body
LE: loop exit
PB: predicated region body
PF: predicated region fallthrough
CT: control target
= control target key end

     0   :  { %8 = vsyncpa [#allocation3], 0  ;;  %s3877_s0 = inlined_call_operand.vmem [shape: f32[16,18,18,3], index: 0, kind: input, shape index: {}]   ;;  %s3878_s1 = inlined_call_operand.vmem [shape: bf16[128,128], index: 1, kind: input, shape index: {}]   ;;  %s3879_s2 = inlined_call_operand.vmem [shape: f32[1,128], index: 2, kind: input, shape index: {}]   ;;  %s3880_s3 = inlined_call_operand.hbm [shape: f32[16,8,8,128], index: 3, kind: output, shape index: {}]  }
   0x1   :  { %10 = vsyncpa [#allocation3 + $0x1], 0  ;;  %s2733_s12 = smov 0   ;;  %s2735_s13 = smov 0  }
   0x2   :  { %s2737_s14 = smov 0   ;;  %s2739_s15 = smov 0  }
   0x3   :  { %s2741_s16 = smov 0   ;;  %s2743_s17 = smov 0  }
   0x4   :  { %s2745_s18 = smov 0   ;;  %s2747_s19 = smov 0  }
   0x5 LB: > { %s2081_s20 = sadd.s32 4294967295, %s2699_s19   ;;  %s2082_s21 = sadd.s32 4294967294, %s2699_s19   ;;  %s2699_s19 = sphi %s2747_s19, %s16_s19   ;;  %s2695_s18 = sphi %s2745_s18, %s3891_s18   ;;  %s2691_s17 = sphi %s2743_s17, %s3890_s17   ;;  %s2687_s16 = sphi %s2741_s16, %s3889_s16   ;;  %s2683_s15 = sphi %s2739_s15, %s3888_s15   ;;  %s2679_s14 = sphi %s2737_s14, %s3887_s14   ;;  %s2675_s13 = sphi %s2735_s13, %s3886_s13   ;;  %s2671_s12 = sphi %s2733_s12, %s3885_s12  }
   0x6   : > { %s25_s22 = sadd.s32 1, %s2691_s17  ;;  %s28_s23 = sadd.s32 1, %s2695_s18 }
   0x7   : > { %p26_p0 = scmp.ge.s32.totalorder %s25_s22, 2  ;;  %p115_p1 = scmp.ne.s32.totalorder %s2679_s14, %s2675_s13 }
   0x8   : > { %p116_p2 = scmp.eq.s32.totalorder %s2081_s20, 31  ;;  %p121_p5 = scmp.ne.s32.totalorder %s2675_s13, %s2671_s12 }
   0x9   : > { %s3893_s22 = smov (%p26_p0, %s25_s22), 0  ;;  %s3895_s23 = smov (!%p26_p0, %s28_s23), %s2695_s18 }
   0xa   : > { %s101_s24 = ssub.s32 %s2691_s17, %s3893_s22  ;;  %p2784_p3 = por %p116_p2, %p115_p1 }
   0xb   : > { %p30_p4 = scmp.ge.s32.totalorder %s3895_s23, 16  ;;  %p122_p6 = scmp.eq.s32.totalorder %s2082_s21, 31 }
   0xc   : > { %p2085_p7 = scmp.ge.s32.totalorder %s2699_s19, 1  ;;  %p154_p9 = scmp.lt.s32.totalorder %s2699_s19, 33 }
   0xd   : > { %s3897_s23 = smov (%p30_p4, %s3895_s23), 0  ;;  %p2793_p8 = por %p122_p6, %p121_p5 }
   0xe   : > { %s100_s27 = ssub.s32 %s2695_s18, %s3897_s23  ;;  %s105_s28 = sadd.s32 1, %s2679_s14 }
   0xf   : > { %s102_s29 = sor.u32 %s101_s24, %s100_s27  ;;  %p155_p10 = pnand %p2085_p7, %p154_p9 }
  0x10   : > { %p103_p11 = scmp.eq.s32.totalorder %s102_s29, 0  ;;  %p178_p12 = scmp.lt.s32.totalorder (!%p155_p10), %s2687_s16, 15  ;;  %vm242_vm0 = vcmask (!%p155_p10), 1046528   ;;  %vm331_vm1 = vcmask (!%p155_p10), 1045504   ;;  %vm734_vm2 = vcmask (!%p155_p10), 23552   ;;  %vm751_vm3 = vcmask (!%p155_p10), 48128  }
  0x11   : > { %158 = sbr.rel (%p155_p10) target bundleno = 610 (0x262), region = 32  ;;  %s2701_s11 = smov (!%p155_p10), 3   ;;  %vm768_vm4 = vcmask (!%p155_p10), 72704   ;;  %vm785_vm5 = vcmask (!%p155_p10), 97280   ;;  %vm802_vm6 = vcmask (!%p155_p10), 121856   ;;  %vm819_vm7 = vcmask (!%p155_p10), 146432  }
  0x12   : > { %s2802_s30 = scalar_select %p103_p11, %s2679_s14, %s105_s28  }
  0x13   : > { %s2089_s5 = smul.u32 (!%p155_p10), 192, %s2683_s15  ;;  %s2702_s20 = smov (!%p155_p10), 6   ;;  %vm836_vm8 = vcmask (!%p155_p10), 171008   ;;  %vm853_vm9 = vcmask (!%p155_p10), 195584   ;;  %vm870_vm10 = vcmask (!%p155_p10), 220160   ;;  %vm1431_vm12 = vcmask (!%p155_p10), 1041408  }
  0x14   : > { %s2703_s21 = smov (!%p155_p10), 9   ;;  %s2704_s24 = smov (!%p155_p10), 12   ;;  %vm3284_vm11 = vmpackc.low (!%p155_p10), %vm870_vm10, %vm870_vm10  ;;  %vm1944_vm13 = vcmask (!%p155_p10), 1041409   ;;  %vm1946_vm14 = vcmask (!%p155_p10), 1042434   ;;  %vm1948_vm15 = vcmask (!%p155_p10), 1043459  }
  0x15   : > { %s2706_s27 = smov (!%p155_p10), 18   ;;  %s2708_s29 = smov (!%p155_p10), 24  }
  0x18   : > { %s179_s4 = scalar_select %p178_p12, %s2687_s16, 15 }
  0x1a   : > { %s2193_s6 = smul.u32 432, %s179_s4  ;;  %s2124_s4 = sshll.u32 %s2683_s15, 2 }
  0x1c   : > { %s182_s9 = scalar_lea.vmem %s3877_s0, %s2193_s6  ;;  %s2707_s6 = smov 21  }
  0x1d   : > { %s2810_s10 = scalar_lea.vmem %s182_s9, %s2089_s5  ;;  %s2705_s5 = smov 15  }
  0x1e   : > { %v2813_v0 = vld [vmem:[%s2810_s10 + $0x18] sm:$0xff]  ;;  %v2816_v1 = vld [vmem:[%s2810_s10 + $0x20] sm:$0xff]  ;;  %v2819_v2 = vld [vmem:[%s2810_s10 + $0x28] sm:$0x3] }
  0x1f   : > { %v248_v3 = vrot.slane %v2813_v0, 1  ;;  %v249_v4 = vrot.slane %v2816_v1, 1  ;;  %v251_v5 = vrot.slane %v2819_v2, 1  ;;  %v2825_v6 = vld [vmem:[%s2810_s10] sm:$0xff]  ;;  %v2828_v7 = vld [vmem:[%s2810_s10 + $0x8] sm:$0xff]  ;;  %v2834_v11 = vld [vmem:[%s2810_s10 + $0x78] sm:$0xff]  ;;  %v2311_v63 = vpack.i.bf16 %v2816_v1, %v2813_v0 }
  0x20   : > { %v190_v8 = vld [vmem:[%s2810_s10 + $0x10] sm:$0x3]  ;;  %v243_v9 = vrot.slane %v2825_v6, 1  ;;  %v244_v10 = vrot.slane %v2828_v7, 1  ;;  %v2837_v12 = vld [vmem:[%s2810_s10 + $0x80] sm:$0xff]  ;;  %v340_v15 = vrot.slane %v2819_v2, 2 }
  0x21   : > { %v250_v13 = vsel %vm242_vm0, %v248_v3, %v249_v4  ;;  %v252_v14 = vsel %vm242_vm0, %v249_v4, %v251_v5  ;;  %v246_v16 = vrot.slane %v190_v8, 1  ;;  %v205_v17 = vld [vmem:[%s2810_s10 + $0x88] sm:$0x3]  ;;  %v2844_v18 = vld [vmem:[%s2810_s10 + $0x60] sm:$0xff]  ;;  %v335_v22 = vrot.slane %v190_v8, 2  ;;  %v2905_v61 = vld [vmem:[%s2810_s10 + $0x90] sm:$0xff] }
  0x22   : > { %v2847_v19 = vld [vmem:[%s2810_s10 + $0x68] sm:$0xff]  ;;  %v2849_v20 = vpack.i.bf16 %v252_v14, %v250_v13  ;;  %v245_v21 = vsel %vm242_vm0, %v243_v9, %v244_v10  ;;  %v268_v23 = vrot.slane %v2834_v11, 1  ;;  %v202_v24 = vld [vmem:[%s2810_s10 + $0x70] sm:$0x3]  ;;  %v269_v26 = vrot.slane %v2837_v12, 1  ;;  %v2908_v62 = vld [vmem:[%s2810_s10 + $0x98] sm:$0xff] }
  0x23   : > { %v247_v25 = vsel %vm242_vm0, %v244_v10, %v246_v16  ;;  %v271_v27 = vrot.slane %v205_v17, 1  ;;  %v263_v28 = vrot.slane %v2844_v18, 1  ;;  %v264_v30 = vrot.slane %v2847_v19, 1  ;;  %v208_v2 = vld [vmem:[%s2810_s10 + $0xa0] sm:$0x3]  ;;  %v2916_v3 = vld [vmem:[%s2810_s10 + $0x30] sm:$0xff] }
  0x24   : > { %2287 = vrot.lane.b32.xlu1 %v2849_v20, %s2701_s11  ;;  %v2276_v29 = vpack.i.bf16 %v247_v25, %v245_v21  ;;  %v266_v31 = vrot.slane %v202_v24, 1  ;;  %v352_v32 = vrot.slane %v2844_v18, 2  ;;  %v270_v33 = vsel %vm242_vm0, %v268_v23, %v269_v26  ;;  %v2919_v4 = vld [vmem:[%s2810_s10 + $0x38] sm:$0xff]  ;;  %v196_v8 = vld [vmem:[%s2810_s10 + $0x40] sm:$0x3] }
  0x25   : > { %v272_v34 = vsel %vm242_vm0, %v269_v26, %v271_v27  ;;  %v353_v35 = vrot.slane %v2847_v19, 2  ;;  %v355_v36 = vrot.slane %v202_v24, 2  ;;  %v265_v38 = vsel %vm242_vm0, %v263_v28, %v264_v30 }
  0x26   : > { %2277 = vrot.lane.b32.xlu0 %v2276_v29, %s2701_s11  ;;  %v2865_v37 = vpack.i.bf16 %v272_v34, %v270_v33  ;;  %v267_v39 = vsel %vm242_vm0, %v264_v30, %v266_v31  ;;  %v332_v40 = vrot.slane %v2825_v6, 2  ;;  %v333_v44 = vrot.slane %v2828_v7, 2  ;;  %v214_v31 = vld [vmem:[%s2810_s10 + $0xd0] sm:$0x3]  ;;  %v2958_v34 = vld [vmem:[%s2810_s10 + $0xc0] sm:$0xff] }
  0x27   : > { %v2870_v41 = vpack.i.bf16 %v267_v39, %v265_v38  ;;  %v354_v42 = vsel %vm331_vm1, %v352_v32, %v353_v35  ;;  %v356_v43 = vsel %vm331_vm1, %v353_v35, %v355_v36  ;;  %v357_v46 = vrot.slane %v2834_v11, 2  ;;  %v2596_v32 = vld [vmem:[%s3878_s1] sm:$0xff]   ;;  %v2966_v38 = vld [vmem:[%s2810_s10 + $0xc8] sm:$0xff] }
  0x28   : > { %2292 = vrot.lane.b32.xlu1 %v2865_v37, %s2701_s11  ;;  %v2877_v45 = vpack.i.bf16 %v356_v43, %v354_v42  ;;  %v358_v47 = vrot.slane %v2837_v12, 2  ;;  %v360_v48 = vrot.slane %v205_v17, 2  ;;  %v334_v49 = vsel %vm331_vm1, %v332_v40, %v333_v44  ;;  %2145 = vmatprep.subr.bf16.mxu0 %v2596_v32 }
  0x29   : > { %v336_v50 = vsel %vm331_vm1, %v333_v44, %v335_v22  ;;  %v337_v51 = vrot.slane %v2813_v0, 2  ;;  %v338_v52 = vrot.slane %v2816_v1, 2  ;;  %v2902_v60 = vpack.i.bf16 %v2837_v12, %v2834_v11  ;;  %2177 = vmatprep.subr.bf16.mxu1 %v2596_v32  ;;  %2146 = vmatpush3.bf16.msra.mxu0 %v2596_v32 }
  0x2a   : > { %2282 = vrot.lane.b32.xlu0 %v2870_v41, %s2701_s11  ;;  %v2296_v53 = vpack.i.bf16 %v336_v50, %v334_v49  ;;  %v359_v54 = vsel %vm331_vm1, %v357_v46, %v358_v47  ;;  %v361_v55 = vsel %vm331_vm1, %v358_v47, %v360_v48  ;;  %v2925_v5 = vpack.i.bf16 %v2908_v62, %v2905_v61  ;;  %v2597_v48 = vld [vmem:[%s3878_s1 + $0x8] sm:$0xff]  }
  0x2b   : > { %v339_v56 = vsel %vm331_vm1, %v337_v51, %v338_v52  ;;  %v341_v57 = vsel %vm331_vm1, %v338_v52, %v340_v15  ;;  %v2893_v58 = vpack.i.bf16 %v361_v55, %v359_v54  ;;  %v273_v9 = vrot.slane %v2905_v61, 1  ;;  %2185 = vmatpush3.bf16.msra.mxu1 %v2596_v32  ;;  %v2989_v55 = vld [vmem:[%s2810_s10 + $0xe0] sm:$0xff]  ;;  %2147 = vmatprep.subr.bf16.mxu0 %v2597_v48  ;;  %v3045_v32 = vld [vmem:[%s2810_s10 + $0x48] sm:$0xff] }
  0x2c   : > { %2302 = vrot.lane.b32.xlu1 %v2877_v45, %s2702_s20  ;;  %v2896_v59 = vpack.i.bf16 %v341_v57, %v339_v56  ;;  %v274_v10 = vrot.slane %v2908_v62, 1  ;;  %v276_v13 = vrot.slane %v208_v2, 1  ;;  %v2933_v14 = vpack.i.bf16 %v2919_v4, %v2916_v3  ;;  %v217_v56 = vld [vmem:[%s2810_s10 + $0xe8] sm:$0x3]  ;;  %2178 = vmatprep.subr.bf16.mxu1 %v2597_v48 }
  0x2d   : > { %v253_v15 = vrot.slane %v2916_v3, 1  ;;  %v254_v16 = vrot.slane %v2919_v4, 1  ;;  %v256_v17 = vrot.slane %v196_v8, 1  ;;  %v362_v23 = vrot.slane %v2905_v61, 2  ;;  %2148 = vmatpush3.bf16.msra.mxu0 %v2597_v48 }
  0x2e   : > { %2297 = vrot.lane.b32.xlu0 %v2296_v53, %s2702_s20  ;;  %v275_v21 = vsel %vm242_vm0, %v273_v9, %v274_v10  ;;  %v277_v22 = vsel %vm242_vm0, %v274_v10, %v276_v13  ;;  %v363_v24 = vrot.slane %v2908_v62, 2  ;;  %v365_v27 = vrot.slane %v208_v2, 2  ;;  %v2997_v2 = vld [vmem:[%s2810_s10 + $0xd8] sm:$0xff] }
  0x2f   : > { %v255_v25 = vsel %vm242_vm0, %v253_v15, %v254_v16  ;;  %v257_v26 = vsel %vm242_vm0, %v254_v16, %v256_v17  ;;  %v2949_v28 = vpack.i.bf16 %v277_v22, %v275_v21  ;;  %v342_v29 = vrot.slane %v2916_v3, 2  ;;  %v2598_v16 = vld [vmem:[%s3878_s1 + $0x10] sm:$0xff]   ;;  %2186 = vmatpush3.bf16.msra.mxu1 %v2597_v48  ;;  %v2601_v48 = vld [vmem:[%s3878_s1 + $0x28] sm:$0xff]  }
  0x30   : > { %2317 = vrot.lane.b32.xlu1 %v2893_v58, %s2702_s20  ;;  %v343_v30 = vrot.slane %v2919_v4, 2  ;;  %v345_v33 = vrot.slane %v196_v8, 2  ;;  %v2962_v35 = vpack.i.bf16 %v257_v26, %v255_v25  ;;  %v364_v36 = vsel %vm331_vm1, %v362_v23, %v363_v24  ;;  %2149 = vmatprep.subr.bf16.mxu0 %v2598_v16  ;;  %v2599_v25 = vld [vmem:[%s3878_s1 + $0x18] sm:$0xff]   ;;  %v3029_v26 = vld [vmem:[%s2810_s10 + $0xa8] sm:$0xff] }
  0x31   : > { %v471_v39 = vrot.slane %v2958_v34, 1  ;;  %v366_v40 = vsel %vm331_vm1, %v363_v24, %v365_v27  ;;  %v472_v42 = vrot.slane %v2966_v38, 1  ;;  %v474_v43 = vrot.slane %v214_v31, 1  ;;  %2179 = vmatprep.subr.bf16.mxu1 %v2598_v16  ;;  %2150 = vmatpush3.bf16.msra.mxu0 %v2598_v16  ;;  %v3032_v27 = vld [vmem:[%s2810_s10 + $0xb0] sm:$0xff] }
  0x32   : > { %2307 = vrot.lane.b32.xlu0 %v2896_v59, %s2702_s20  ;;  %v524_v44 = vrot.slane %v2958_v34, 2  ;;  %v525_v46 = vrot.slane %v2966_v38, 2  ;;  %v527_v47 = vrot.slane %v214_v31, 2  ;;  %v346_v49 = vsel %vm331_vm1, %v343_v30, %v345_v33  ;;  %2151 = vmatprep.subr.bf16.mxu0 %v2599_v25  ;;  %v3048_v33 = vld [vmem:[%s2810_s10 + $0x50] sm:$0xff] }
  0x33   : > { %v473_v50 = vsel %vm242_vm0, %v471_v39, %v472_v42  ;;  %v475_v51 = vsel %vm242_vm0, %v472_v42, %v474_v43  ;;  %v2992_v57 = vpack.i.bf16 %v366_v40, %v364_v36  ;;  %v629_v8 = vrot.slane %v2989_v55, 1  ;;  %2187 = vmatpush3.bf16.msra.mxu1 %v2598_v16  ;;  %v199_v39 = vld [vmem:[%s2810_s10 + $0x58] sm:$0x3]  ;;  %v2600_v40 = vld [vmem:[%s3878_s1 + $0x20] sm:$0xff]  }
  0x34   : > { %2322 = vrot.lane.b32.xlu1 %v2902_v60, %s2703_s21  ;;  %v2984_v52 = vpack.i.bf16 %v475_v51, %v473_v50  ;;  %v526_v53 = vsel %vm331_vm1, %v524_v44, %v525_v46  ;;  %v528_v54 = vsel %vm331_vm1, %v525_v46, %v527_v47  ;;  %v682_v9 = vrot.slane %v2989_v55, 2  ;;  %2180 = vmatprep.subr.bf16.mxu1 %v2599_v25 }
  0x35   : > { %v628_v13 = vrot.slane %v2997_v2, 1  ;;  %v681_v15 = vrot.slane %v2997_v2, 2  ;;  %v631_v17 = vrot.slane %v217_v56, 1  ;;  %v684_v24 = vrot.slane %v217_v56, 2  ;;  %2152 = vmatpush3.bf16.msra.mxu0 %v2599_v25 }
  0x36   : > { %2312 = vrot.lane.b32.xlu0 %v2311_v63, %s2703_s21  ;;  %v2994_v63 = vpack.i.bf16 %v528_v54, %v526_v53  ;;  %v3054_v36 = vpack.i.bf16 %v3032_v27, %v3029_v26  ;;  %v278_v42 = vrot.slane %v3029_v26, 1  ;;  %v279_v43 = vrot.slane %v3032_v27, 1  ;;  %2153 = vmatprep.subr.bf16.mxu0 %v2600_v40  ;;  %v2602_v54 = vld [vmem:[%s3878_s1 + $0x30] sm:$0xff]  }
  0x37   : > { %v3013_v21 = vsel %vm242_vm0, %v628_v13, %v629_v8  ;;  %v3016_v22 = vsel %vm331_vm1, %v681_v15, %v682_v9  ;;  %v3019_v23 = vsel %vm242_vm0, %v629_v8, %v631_v17  ;;  %2188 = vmatpush3.bf16.msra.mxu1 %v2599_v25  ;;  %v258_v44 = vrot.slane %v3045_v32, 1  ;;  %v2603_v8 = vld [vmem:[%s3878_s1 + $0x38] sm:$0xff]  }
  0x38   : > { %2332 = vrot.lane.b32.xlu1 %v2925_v5, %s2703_s21  ;;  %v259_v46 = vrot.slane %v3048_v33, 1  ;;  %v261_v47 = vrot.slane %v199_v39, 1  ;;  %2181 = vmatprep.subr.bf16.mxu1 %v2600_v40  ;;  %v368_v13 = vrot.slane %v3032_v27, 2  ;;  %v347_v16 = vrot.slane %v3045_v32, 2 }
  0x39   : > { %2154 = vmatpush3.bf16.msra.mxu0 %v2600_v40  ;;  %v348_v17 = vrot.slane %v3048_v33, 2 }
  0x3a   : > { %2327 = vrot.lane.b32.xlu0 %v2933_v14, %s2703_s21  ;;  %2155 = vmatprep.subr.bf16.mxu0 %v2601_v48  ;;  %v260_v50 = vsel %vm242_vm0, %v258_v44, %v259_v46  ;;  %v262_v51 = vsel %vm242_vm0, %v259_v46, %v261_v47 }
  0x3b   : > { %2189 = vmatpush3.bf16.msra.mxu1 %v2600_v40  ;;  %v2406_v56 = vpack.i.bf16 %v262_v51, %v260_v50 }
  0x3c   : > { %2342 = vrot.lane.b32.xlu1 %v2865_v37, %s2704_s24  ;;  %2182 = vmatprep.subr.bf16.mxu1 %v2601_v48 }
  0x3d   : > { %2156 = vmatpush3.bf16.msra.mxu0 %v2601_v48 }
  0x3e   : > { %2337 = vrot.lane.b32.xlu0 %v2849_v20, %s2704_s24  ;;  %v344_v20 = vsel %vm331_vm1, %v342_v29, %v343_v30  ;;  %v3035_v29 = vsel %vm331_vm1, %v682_v9, %v684_v24  ;;  %v3040_v30 = vld [vmem:[%s2810_s10 + $0xb8] sm:$0x3]  ;;  %2157 = vmatprep.subr.bf16.mxu0 %v2602_v54  ;;  %v367_v9 = vrot.slane %v3029_v26, 2  ;;  %v350_v24 = vrot.slane %v199_v39, 2 }
  0x3f   : > { %v3003_v10 = vpack.i.bf16 %v346_v49, %v344_v20  ;;  %v2591_v31 = vpack.i.bf16 %v3035_v29, %v3016_v22  ;;  %v281_v20 = vrot.slane %v3040_v30, 1  ;;  %2190 = vmatpush3.bf16.msra.mxu1 %v2601_v48  ;;  %v370_v15 = vrot.slane %v3040_v30, 2 }
  0x40   : > { %2352 = vrot.lane.b32.xlu1 %v2949_v28, %s2704_s24  ;;  %2183 = vmatprep.subr.bf16.mxu1 %v2602_v54  ;;  %v369_v25 = vsel %vm331_vm1, %v367_v9, %v368_v13  ;;  %v349_v30 = vsel %vm331_vm1, %v347_v16, %v348_v17 }
  0x41   : > { %v282_v49 = vsel %vm242_vm0, %v279_v43, %v281_v20  ;;  %2158 = vmatpush3.bf16.msra.mxu0 %v2602_v54  ;;  %v371_v40 = vsel %vm331_vm1, %v368_v13, %v370_v15 }
  0x42   : > { %2347 = vrot.lane.b32.xlu0 %v2962_v35, %s2704_s24  ;;  %2159 = vmatprep.subr.bf16.mxu0 %v2603_v8  ;;  %v2441_v39 = vpack.i.bf16 %v371_v40, %v369_v25 }
  0x43   : > { %2191 = vmatpush3.bf16.msra.mxu1 %v2602_v54 }
  0x44   : > { %2362 = vrot.lane.b32.xlu1 %v2893_v58, %s2705_s5  ;;  %2184 = vmatprep.subr.bf16.mxu1 %v2603_v8 }
  0x45   : > { %2160 = vmatpush3.bf16.msra.mxu0 %v2603_v8 }
  0x46   : > { %2357 = vrot.lane.b32.xlu0 %v2896_v59, %s2705_s5  ;;  %v2571_v59 = vpack.i.bf16 %v3019_v23, %v3013_v21 }
  0x47   : > { %2192 = vmatpush3.bf16.msra.mxu1 %v2603_v8 }
  0x48   : > { %2372 = vrot.lane.b32.xlu1 %v2992_v57, %s2705_s5 }
  0x4a   : > { %2367 = vrot.lane.b32.xlu0 %v3003_v10, %s2705_s5 }
  0x4c   : > { %2382 = vrot.lane.b32.xlu1 %v2925_v5, %s2706_s27  ;;  %v3067_v5 = vpack.i.bf16 %v3048_v33, %v3045_v32 }
  0x4e   : > { %2377 = vrot.lane.b32.xlu0 %v2933_v14, %s2706_s27  ;;  %v280_v14 = vsel %vm242_vm0, %v278_v42, %v279_v43  ;;  %v351_v42 = vsel %vm331_vm1, %v348_v17, %v350_v24  ;;  %vm1950_vm0 = vcmask 1044484   ;;  %vm1952_vm1 = vcmask 1045509  }
  0x4f   : > { %v2411_v53 = vpack.i.bf16 %v282_v49, %v280_v14  ;;  %v2436_v43 = vpack.i.bf16 %v351_v42, %v349_v30 }
  0x50   : > { %2392 = vrot.lane.b32.xlu1 %v3054_v36, %s2706_s27 }
  0x52   : > { %2387 = vrot.lane.b32.xlu0 %v3067_v5, %s2706_s27 }
  0x54   : > { %2402 = vrot.lane.b32.xlu1 %v2949_v28, %s2707_s6 }
  0x56   : > { %2397 = vrot.lane.b32.xlu0 %v2962_v35, %s2707_s6 }
  0x58   : > { %2412 = vrot.lane.b32.xlu1 %v2411_v53, %s2707_s6 }
  0x5a   : > { %2407 = vrot.lane.b32.xlu0 %v2406_v56, %s2707_s6 }
  0x5c   : > { %2422 = vrot.lane.b32.xlu1 %v2992_v57, %s2708_s29 }
  0x5e   : > { %2417 = vrot.lane.b32.xlu0 %v3003_v10, %s2708_s29 }
  0x60   : > { %2432 = vrot.lane.b32.xlu1 %v2949_v28, %s2701_s11  ;;  %v2491_v28 = vpack.i.bf16 %v2966_v38, %v2958_v34  ;;  %v2551_v34 = vpack.i.bf16 %v2989_v55, %v2997_v2 }
  0x62   : > { %2427 = vrot.lane.b32.xlu0 %v2962_v35, %s2701_s11  ;;  %v2486_v35 = vpack.i.bf16 %v2847_v19, %v2844_v18 }
  0x64   : > { %2442 = vrot.lane.b32.xlu1 %v2441_v39, %s2708_s29 }
  0x66   : > { %2437 = vrot.lane.b32.xlu0 %v2436_v43, %s2708_s29 }
  0x68   : > { %2452 = vrot.lane.b32.xlu1 %v2411_v53, %s2701_s11 }
  0x6a   : > { %2447 = vrot.lane.b32.xlu0 %v2406_v56, %s2701_s11 }
  0x6c   : > { %2462 = vrot.lane.b32.xlu1 %v2992_v57, %s2702_s20 }
  0x6e   : > { %2457 = vrot.lane.b32.xlu0 %v3003_v10, %s2702_s20 }
  0x70   : > { %2472 = vrot.lane.b32.xlu1 %v2441_v39, %s2702_s20 }
  0x72   : > { %2467 = vrot.lane.b32.xlu0 %v2436_v43, %s2702_s20  ;;  %s2710_s20 = smov [#allocation2]  }
  0x74   : > { %2482 = vrot.lane.b32.xlu1 %v3054_v36, %s2703_s21 }
  0x76   : > { %2477 = vrot.lane.b32.xlu0 %v3067_v5, %s2703_s21 }
  0x78   : > { %2492 = vrot.lane.b32.xlu1 %v2491_v28, %s2703_s21 }
  0x7a   : > { %2487 = vrot.lane.b32.xlu0 %v2486_v35, %s2703_s21  ;;  %s175_s21 = sand.u32 1, %s2675_s13  }
  0x7c   : > { %2502 = vrot.lane.b32.xlu1 %v2411_v53, %s2704_s24 }
  0x7e   : > { %2497 = vrot.lane.b32.xlu0 %v2406_v56, %s2704_s24 }
  0x80   : > { %2512 = vrot.lane.b32.xlu1 %v2984_v52, %s2704_s24 }
  0x82   : > { %2507 = vrot.lane.b32.xlu0 %v2870_v41, %s2704_s24  ;;  %s2086_s24 = sshll.u32 %s175_s21, 5 }
  0x84   : > { %2522 = vrot.lane.b32.xlu1 %v2441_v39, %s2705_s5 }
  0x86   : > { %2517 = vrot.lane.b32.xlu0 %v2436_v43, %s2705_s5 }
  0x88   : > { %2532 = vrot.lane.b32.xlu1 %v2994_v63, %s2705_s5 }
  0x8a   : > { %2527 = vrot.lane.b32.xlu0 %v2877_v45, %s2705_s5  ;;  %s3672_s5 = scalar_lea.vmem [#allocation2], %s2086_s24  ;;  %s2609_s24 = sshll.u32 %s2710_s20, 4  ;;  %s2610_s24 = int_to_ptr.vmem [resolvable:$false] %s2609_s24 }
  0x8b   : > { %s2003_s7 = sshll.u32 %s3672_s5, 4  ;;  %s3818_s7 = int_to_ptr.vmem [resolvable:$true] %s2003_s7 }
  0x8c   : > { %2542 = vrot.lane.b32.xlu1 %v2491_v28, %s2706_s27  ;;  %s2605_s11 = scalar_lea.vmem %s3818_s7, 512  ;;  %p2612_p2 = scmp.lt.s32.totalorder %s3818_s7, %s2610_s24 }
  0x8d   : > { %p2606_p13 = scmp.ne.s32.totalorder %s3818_s7, %s2605_s11 }
  0x8e   : > { %2537 = vrot.lane.b32.xlu0 %v2486_v35, %s2706_s27 }
  0x8f   : > { %p2607_p0 = pnand %p2606_p13, %p2784_p3 }
  0x90   : > { %2552 = vrot.lane.b32.xlu1 %v2551_v34, %s2706_s27 }
  0x91   : > { %p2608_p1 = pneg %p2607_p0 }
  0x92   : > { %2547 = vrot.lane.b32.xlu0 %v2902_v60, %s2706_s27  ;;  %s2611_s27 = scalar_lea.vmem %s2610_s24, 1024 }
  0x93   : > { %p2613_p4 = scmp.lt.s32.totalorder %s2611_s27, %s2605_s11 }
  0x94   : > { %2562 = vrot.lane.b32.xlu1 %v2984_v52, %s2707_s6 }
  0x95   : > { %p2614_p5 = por %p2613_p4, %p2612_p2 }
  0x96   : > { %2557 = vrot.lane.b32.xlu0 %v2870_v41, %s2707_s6  ;;  %v2288_v38 = vpop.permute.xlu1 %2287 }
  0x97   : > { %v2289_v20 = vunpack.i.l.bf16 %v2288_v38  ;;  %p2615_p6 = pnand %p2614_p5, %p2608_p1 }
  0x98   : > { %v2278_v57 = vpop.permute.xlu0 %2277  ;;  %2572 = vrot.lane.b32.xlu1 %v2571_v59, %s2707_s6 }
  0x99   : > { %v2280_v5 = vunpack.i.h.bf16 %v2278_v57  ;;  %v2279_v44 = vunpack.i.l.bf16 %v2278_v57  ;;  %v737_v56 = vsel %vm734_vm2, %v2813_v0, %v2289_v20 }
  0x9a   : > { %2567 = vrot.lane.b32.xlu0 %v2865_v37, %s2707_s6  ;;  %v2293_v55 = vpop.permute.xlu1 %2292  ;;  %s2125_s6 = sshll.u32 %s2687_s16, 3 }
  0x9b   : > { %v2295_v14 = vunpack.i.h.bf16 %v2293_v55  ;;  %v2294_v49 = vunpack.i.l.bf16 %v2293_v55  ;;  %v736_v13 = vsel %vm734_vm2, %v2828_v7, %v2280_v5  ;;  %v735_v15 = vsel %vm734_vm2, %v2825_v6, %v2279_v44  ;;  %s2000_s15 = sadd.s32 %s2125_s6, %s2124_s4 }
  0x9c   : > { %v2283_v2 = vpop.permute.xlu0 %2282  ;;  %2582 = vrot.lane.b32.xlu1 %v2994_v63, %s2708_s29  ;;  %s2126_s16 = sshll.u32 %s2000_s15, 7 }
  0x9d   : > { %v2285_v47 = vunpack.i.h.bf16 %v2283_v2  ;;  %v2284_v48 = vunpack.i.l.bf16 %v2283_v2  ;;  %v746_v30 = vsel %vm734_vm2, %v2837_v12, %v2295_v14  ;;  %v745_v7 = vsel %vm734_vm2, %v2834_v11, %v2294_v49  ;;  %s3816_s28 = scalar_lea.hbm %s3880_s3, %s2126_s16 }
  0x9e   : > { %2577 = vrot.lane.b32.xlu0 %v2877_v45, %s2708_s29  ;;  %v2303_v60 = vpop.permute.xlu1 %2302 }
  0x9f   : > { %v2305_v50 = vunpack.i.h.bf16 %v2303_v60  ;;  %v2304_v51 = vunpack.i.l.bf16 %v2303_v60  ;;  %v744_v25 = vsel %vm734_vm2, %v2847_v19, %v2285_v47 }
  0xa0   : > { %v2298_v41 = vpop.permute.xlu0 %2297  ;;  %2592 = vrot.lane.b32.xlu1 %v2591_v31, %s2708_s29  ;;  %v2290_v31 = vunpack.i.h.bf16 %v2288_v38 }
  0xa1   : > { %v2300_v8 = vunpack.i.h.bf16 %v2298_v41  ;;  %v2299_v9 = vunpack.i.l.bf16 %v2298_v41  ;;  %v761_v42 = vsel %vm751_vm3, %v744_v25, %v2305_v50 }
  0xa2   : > { %2587 = vrot.lane.b32.xlu0 %v2893_v58, %s2708_s29  ;;  %v2318_v52 = vpop.permute.xlu1 %2317  ;;  %v738_v54 = vsel %vm734_vm2, %v2816_v1, %v2290_v31  ;;  %v743_v1 = vsel %vm734_vm2, %v2844_v18, %v2284_v48  ;;  %s3825_s29 = scalar_lea.sflag [#allocation3], %s175_s21 }
  0xa3   : > { %v2320_v16 = vunpack.i.h.bf16 %v2318_v52  ;;  %v2319_v17 = vunpack.i.l.bf16 %v2318_v52  ;;  %v760_v6 = vsel %vm751_vm3, %v743_v1, %v2304_v51  ;;  %v752_v19 = vsel %vm751_vm3, %v735_v15, %v2299_v9 }
  0xa4   : > { %v2308_v37 = vpop.permute.xlu0 %2307  ;;  %v753_v43 = vsel %vm751_vm3, %v736_v13, %v2300_v8 }
  0xa5   : > { %v2310_v0 = vunpack.i.h.bf16 %v2308_v37  ;;  %v2309_v40 = vunpack.i.l.bf16 %v2308_v37  ;;  %v762_v12 = vsel %vm751_vm3, %v745_v7, %v2319_v17  ;;  %v763_v35 = vsel %vm751_vm3, %v746_v30, %v2320_v16 }
  0xa6   : > { %v3170_v10 = vpop.permute.xlu1 %2322 }
  0xa7   : > { %v2325_v18 = vunpack.i.h.bf16 %v3170_v10  ;;  %v2324_v28 = vunpack.i.l.bf16 %v3170_v10  ;;  %v755_v57 = vsel %vm751_vm3, %v738_v54, %v2310_v0  ;;  %v754_v55 = vsel %vm751_vm3, %v737_v56, %v2309_v40 }
  0xa8   : > { %v3172_v21 = vpop.permute.xlu0 %2312 }
  0xa9   : > { %v2315_v11 = vunpack.i.h.bf16 %v3172_v21  ;;  %v2314_v34 = vunpack.i.l.bf16 %v3172_v21  ;;  %v777_v31 = vsel %vm768_vm4, %v760_v6, %v2324_v28  ;;  %v778_v20 = vsel %vm768_vm4, %v761_v42, %v2325_v18 }
  0xaa   : > { %v3174_v63 = vpop.permute.xlu1 %2332 }
  0xab   : > { %v2335_v2 = vunpack.i.h.bf16 %v3174_v63  ;;  %v2334_v60 = vunpack.i.l.bf16 %v3174_v63  ;;  %v769_v63 = vsel %vm768_vm4, %v752_v19, %v2314_v34 }
  0xac   : > { %v3176_v23 = vpop.permute.xlu0 %2327 }
  0xad   : > { %v2330_v41 = vunpack.i.h.bf16 %v3176_v23  ;;  %v2329_v52 = vunpack.i.l.bf16 %v3176_v23  ;;  %v770_v23 = vsel %vm768_vm4, %v753_v43, %v2315_v11  ;;  %v779_v14 = vsel %vm768_vm4, %v762_v12, %v2334_v60 }
  0xae   : > { %v3178_v45 = vpop.permute.xlu1 %2342  ;;  %v780_v49 = vsel %vm768_vm4, %v763_v35, %v2335_v2 }
  0xaf   : > { %v2345_v37 = vunpack.i.h.bf16 %v3178_v45  ;;  %v2344_v10 = vunpack.i.l.bf16 %v3178_v45  ;;  %v771_v51 = vsel %vm768_vm4, %v754_v55, %v2329_v52  ;;  %v772_v54 = vsel %vm768_vm4, %v755_v57, %v2330_v41 }
  0xb0   : > { %v3180_v59 = vpop.permute.xlu0 %2337 }
  0xb1   : > { %v2340_v5 = vunpack.i.h.bf16 %v3180_v59  ;;  %v2339_v44 = vunpack.i.l.bf16 %v3180_v59  ;;  %v794_v56 = vsel %vm785_vm5, %v777_v31, %v2344_v10  ;;  %v795_v8 = vsel %vm785_vm5, %v778_v20, %v2345_v37 }
  0xb2   : > { %v3182_v36 = vpop.permute.xlu1 %2352 }
  0xb3   : > { %v2355_v47 = vunpack.i.h.bf16 %v3182_v36  ;;  %v2354_v45 = vunpack.i.l.bf16 %v3182_v36  ;;  %v786_v9 = vsel %vm785_vm5, %v769_v63, %v2339_v44  ;;  %v787_v13 = vsel %vm785_vm5, %v770_v23, %v2340_v5 }
  0xb4   : > { %v3184_v22 = vpop.permute.xlu0 %2347 }
  0xb5   : > { %v796_v17 = vsel %vm785_vm5, %v779_v14, %v2354_v45  ;;  %v2350_v25 = vunpack.i.h.bf16 %v3184_v22  ;;  %v2349_v1 = vunpack.i.l.bf16 %v3184_v22 }
  0xb6   : > { %v3186_v29 = vpop.permute.xlu1 %2362 }
  0xb7   : > { %v2365_v50 = vunpack.i.h.bf16 %v3186_v29  ;;  %v2364_v59 = vunpack.i.l.bf16 %v3186_v29  ;;  %v797_v29 = vsel %vm785_vm5, %v780_v49, %v2355_v47 }
  0xb8   : > { %v3188_v58 = vpop.permute.xlu0 %2357 }
  0xb9   : > { %v2360_v15 = vunpack.i.h.bf16 %v3188_v58  ;;  %v2359_v16 = vunpack.i.l.bf16 %v3188_v58  ;;  %v811_v40 = vsel %vm802_vm6, %v794_v56, %v2364_v59  ;;  %v812_v30 = vsel %vm802_vm6, %v795_v8, %v2365_v50 }
  0xba   : > { %v3190_v46 = vpop.permute.xlu1 %2372 }
  0xbb   : > { %v803_v22 = vsel %vm802_vm6, %v786_v9, %v2359_v16  ;;  %v804_v28 = vsel %vm802_vm6, %v787_v13, %v2360_v15  ;;  %v2375_v12 = vunpack.i.h.bf16 %v3190_v46  ;;  %v2374_v35 = vunpack.i.l.bf16 %v3190_v46 }
  0xbc   : > { %v3192_v53 = vpop.permute.xlu0 %2367  ;;  %v789_v16 = vsel %vm785_vm5, %v772_v54, %v2350_v25 }
  0xbd   : > { %v2370_v11 = vunpack.i.h.bf16 %v3192_v53 }
  0xbe   : > { %v3202_v24 = vpop.permute.xlu1 %2382 }
  0xbf   : > { %v2385_v7 = vunpack.i.h.bf16 %v3202_v24  ;;  %v2384_v6 = vunpack.i.l.bf16 %v3202_v24  ;;  %v2369_v24 = vunpack.i.l.bf16 %v3192_v53 }
  0xc0   : > { %v3214_v39 = vpop.permute.xlu0 %2377 }
  0xc1   : > { %v2380_v58 = vunpack.i.h.bf16 %v3214_v39  ;;  %v2379_v42 = vunpack.i.l.bf16 %v3214_v39  ;;  %v828_v39 = vsel %vm819_vm7, %v811_v40, %v2384_v6  ;;  %v829_v2 = vsel %vm819_vm7, %v812_v30, %v2385_v7 }
  0xc2   : > { %v3224_v38 = vpop.permute.xlu1 %2392  ;;  %v813_v40 = vsel %vm802_vm6, %v796_v17, %v2374_v35  ;;  %v814_v30 = vsel %vm802_vm6, %v797_v29, %v2375_v12  ;;  %v806_v7 = vsel %vm802_vm6, %v789_v16, %v2370_v11 }
  0xc3   : > { %v820_v52 = vsel %vm819_vm7, %v803_v22, %v2379_v42  ;;  %v821_v37 = vsel %vm819_vm7, %v804_v28, %v2380_v58  ;;  %v2395_v23 = vunpack.i.h.bf16 %v3224_v38  ;;  %v2394_v49 = vunpack.i.l.bf16 %v3224_v38 }
  0xc4   : > { %v3234_v21 = vpop.permute.xlu0 %2387  ;;  %v788_v38 = vsel %vm785_vm5, %v771_v51, %v2349_v1 }
  0xc5   : > { %v2390_v50 = vunpack.i.h.bf16 %v3234_v21  ;;  %v2389_v8 = vunpack.i.l.bf16 %v3234_v21  ;;  %v805_v21 = vsel %vm802_vm6, %v788_v38, %v2369_v24  ;;  %v830_v51 = vsel %vm819_vm7, %v813_v40, %v2394_v49 }
  0xc6   : > { %v2403_v48 = vpop.permute.xlu1 %2402  ;;  %v831_v54 = vsel %vm819_vm7, %v814_v30, %v2395_v23 }
  0xc7   : > { %v2405_v19 = vunpack.i.h.bf16 %v2403_v48  ;;  %v2404_v43 = vunpack.i.l.bf16 %v2403_v48  ;;  %v822_v29 = vsel %vm819_vm7, %v805_v21, %v2389_v8  ;;  %v823_v1 = vsel %vm819_vm7, %v806_v7, %v2390_v50 }
  0xc8   : > { %v2398_v36 = vpop.permute.xlu0 %2397 }
  0xc9   : > { %v2400_v34 = vunpack.i.h.bf16 %v2398_v36  ;;  %v2399_v57 = vunpack.i.l.bf16 %v2398_v36  ;;  %v845_v46 = vsel %vm836_vm8, %v828_v39, %v2404_v43  ;;  %v846_v31 = vsel %vm836_vm8, %v829_v2, %v2405_v19 }
  0xca   : > { %v3260_v0 = vpop.permute.xlu1 %2412 }
  0xcb   : > { %v837_v45 = vsel %vm836_vm8, %v820_v52, %v2399_v57  ;;  %v838_v48 = vsel %vm836_vm8, %v821_v37, %v2400_v34  ;;  %v2415_v36 = vunpack.i.h.bf16 %v3260_v0  ;;  %v2414_v9 = vunpack.i.l.bf16 %v3260_v0 }
  0xcc   : > { %v3268_v18 = vpop.permute.xlu0 %2407 }
  0xcd   : > { %v2410_v0 = vunpack.i.h.bf16 %v3268_v18  ;;  %v2409_v6 = vunpack.i.l.bf16 %v3268_v18  ;;  %v847_v42 = vsel %vm836_vm8, %v830_v51, %v2414_v9  ;;  %v848_v19 = vsel %vm836_vm8, %v831_v54, %v2415_v36 }
  0xce   : > { %v2423_v55 = vpop.permute.xlu1 %2422 }
  0xcf   : > { %v2425_v60 = vunpack.i.h.bf16 %v2423_v55  ;;  %v2424_v41 = vunpack.i.l.bf16 %v2423_v55  ;;  %v839_v35 = vsel %vm836_vm8, %v822_v29, %v2409_v6  ;;  %v840_v11 = vsel %vm836_vm8, %v823_v1, %v2410_v0 }
  0xd0   : > { %v2418_v10 = vpop.permute.xlu0 %2417 }
  0xd1   : > { %v2420_v20 = vunpack.i.h.bf16 %v2418_v10  ;;  %v2419_v53 = vunpack.i.l.bf16 %v2418_v10  ;;  %v862_v44 = vsel %vm853_vm9, %v845_v46, %v2424_v41  ;;  %v863_v63 = vsel %vm853_vm9, %v846_v31, %v2425_v60 }
  0xd2   : > { %v3291_v47 = vpop.permute.xlu1 %2432  ;;  %v2112_v14 = vpack.c.bf16 %v863_v63, %v862_v44 }
  0xd3   : > { %v854_v59 = vsel %vm853_vm9, %v837_v45, %v2419_v53  ;;  %v855_v56 = vsel %vm853_vm9, %v838_v48, %v2420_v20  ;;  %v2435_v23 = vunpack.i.h.bf16 %v3291_v47  ;;  %v2434_v45 = vunpack.i.l.bf16 %v3291_v47 }
  0xd4   : > { %v3302_v13 = vpop.permute.xlu0 %2427  ;;  %v2100_v15 = vpack.c.bf16 %v855_v56, %v854_v59  ;;  %2169 = vmatprep.mubr.msk.bf16.mxu1 %vm3284_vm11, %v2112_v14 }
  0xd5   : > { %v2430_v14 = vunpack.i.h.bf16 %v3302_v13  ;;  %v2429_v49 = vunpack.i.l.bf16 %v3302_v13  ;;  %v748_v8 = vsel %vm734_vm2, %v2908_v62, %v2435_v23  ;;  %v747_v36 = vsel %vm734_vm2, %v2905_v61, %v2434_v45 }
  0xd6   : > { %2161 = vmatprep.mubr.msk.bf16.mxu0 %vm3284_vm11, %v2100_v15  ;;  %v2443_v58 = vpop.permute.xlu1 %2442 }
  0xd7   : > { %v2445_v25 = vunpack.i.h.bf16 %v2443_v58  ;;  %v2444_v17 = vunpack.i.l.bf16 %v2443_v58  ;;  %v740_v13 = vsel %vm734_vm2, %v2919_v4, %v2430_v14  ;;  %v739_v21 = vsel %vm734_vm2, %v2916_v3, %v2429_v49 }
  0xd8   : > { %v2438_v43 = vpop.permute.xlu0 %2437 }
  0xd9   : > { %v864_v18 = vsel %vm853_vm9, %v847_v42, %v2444_v17  ;;  %v865_v22 = vsel %vm853_vm9, %v848_v19, %v2445_v25  ;;  %v2440_v28 = vunpack.i.h.bf16 %v2438_v43  ;;  %v2439_v12 = vunpack.i.l.bf16 %v2438_v43 }
  0xda   : > { %v2115_v24 = vpack.c.bf16 %v865_v22, %v864_v18  ;;  %v2453_v34 = vpop.permute.xlu1 %2452 }
  0xdb   : > { %v856_v57 = vsel %vm853_vm9, %v839_v35, %v2439_v12  ;;  %v857_v55 = vsel %vm853_vm9, %v840_v11, %v2440_v28  ;;  %v2455_v59 = vunpack.i.h.bf16 %v2453_v34  ;;  %v2454_v56 = vunpack.i.l.bf16 %v2453_v34 }
  0xdc   : > { %v2103_v39 = vpack.c.bf16 %v857_v55, %v856_v57  ;;  %v2448_v2 = vpop.permute.xlu0 %2447  ;;  %2170 = vmatmul.mubr.msk.bf16.vlgmr.msra.gmra.mrb[0].mxu1 %vm3284_vm11, %v2115_v24 }
  0xdd   : > { %v2450_v9 = vunpack.i.h.bf16 %v2448_v2  ;;  %v2449_v15 = vunpack.i.l.bf16 %v2448_v2  ;;  %v750_v61 = vsel %vm734_vm2, %v3032_v27, %v2455_v59  ;;  %v749_v6 = vsel %vm734_vm2, %v3029_v26, %v2454_v56 }
  0xde   : > { %2162 = vmatmul.mubr.msk.bf16.vlgmr.msra.gmra.mrb[0].mxu0 %vm3284_vm11, %v2103_v39  ;;  %v2463_v60 = vpop.permute.xlu1 %2462 }
  0xdf   : > { %v2465_v47 = vunpack.i.h.bf16 %v2463_v60  ;;  %v2464_v16 = vunpack.i.l.bf16 %v2463_v60  ;;  %v742_v54 = vsel %vm734_vm2, %v3048_v33, %v2450_v9  ;;  %v741_v4 = vsel %vm734_vm2, %v3045_v32, %v2449_v15 }
  0xe0   : > { %v2458_v41 = vpop.permute.xlu0 %2457  ;;  %vm1954_vm2 = vcmask 1046534  }
  0xe1   : > { %v2460_v40 = vunpack.i.h.bf16 %v2458_v41  ;;  %v2459_v30 = vunpack.i.l.bf16 %v2458_v41  ;;  %v764_v29 = vsel %vm751_vm3, %v747_v36, %v2464_v16  ;;  %v765_v1 = vsel %vm751_vm3, %v748_v8, %v2465_v47 }
  0xe2   : > { %v2473_v52 = vpop.permute.xlu1 %2472 }
  0xe3   : > { %v2475_v7 = vunpack.i.h.bf16 %v2473_v52  ;;  %v2474_v0 = vunpack.i.l.bf16 %v2473_v52  ;;  %v756_v27 = vsel %vm751_vm3, %v739_v21, %v2459_v30  ;;  %v757_v26 = vsel %vm751_vm3, %v740_v13, %v2460_v40 }
  0xe4   : > { %v2468_v37 = vpop.permute.xlu0 %2467 }
  0xe5   : > { %v2470_v58 = vunpack.i.h.bf16 %v2468_v37  ;;  %v2469_v51 = vunpack.i.l.bf16 %v2468_v37  ;;  %v766_v42 = vsel %vm751_vm3, %v749_v6, %v2474_v0  ;;  %v767_v19 = vsel %vm751_vm3, %v750_v61, %v2475_v7 }
  0xe6   : > { %v2483_v10 = vpop.permute.xlu1 %2482 }
  0xe7   : > { %v2485_v25 = vunpack.i.h.bf16 %v2483_v10  ;;  %v2484_v3 = vunpack.i.l.bf16 %v2483_v10  ;;  %v758_v32 = vsel %vm751_vm3, %v741_v4, %v2469_v51  ;;  %v759_v22 = vsel %vm751_vm3, %v742_v54, %v2470_v58 }
  0xe8   : > { %v2478_v46 = vpop.permute.xlu0 %2477  ;;  %vm1956_vm3 = vcmask 1047559  }
  0xe9   : > { %v2480_v33 = vunpack.i.h.bf16 %v2478_v46  ;;  %v2479_v43 = vunpack.i.l.bf16 %v2478_v46  ;;  %v781_v35 = vsel %vm768_vm4, %v764_v29, %v2484_v3  ;;  %v782_v11 = vsel %vm768_vm4, %v765_v1, %v2485_v25 }
  0xea   : > { %v3332_v31 = vpop.permute.xlu1 %2492 }
  0xeb   : > { %v2495_v28 = vunpack.i.h.bf16 %v3332_v31  ;;  %v2494_v12 = vunpack.i.l.bf16 %v3332_v31  ;;  %v773_v41 = vsel %vm768_vm4, %v756_v27, %v2479_v43  ;;  %v774_v52 = vsel %vm768_vm4, %v757_v26, %v2480_v33 }
  0xec   : > { %v3334_v20 = vpop.permute.xlu0 %2487 }
  0xed   : > { %v2490_v24 = vunpack.i.h.bf16 %v3334_v20  ;;  %v2489_v34 = vunpack.i.l.bf16 %v3334_v20  ;;  %v783_v31 = vsel %vm768_vm4, %v766_v42, %v2494_v12  ;;  %v784_v20 = vsel %vm768_vm4, %v767_v19, %v2495_v28 }
  0xee   : > { %v3336_v53 = vpop.permute.xlu1 %2502 }
  0xef   : > { %v2505_v55 = vunpack.i.h.bf16 %v3336_v53  ;;  %v2504_v39 = vunpack.i.l.bf16 %v3336_v53  ;;  %v775_v45 = vsel %vm768_vm4, %v758_v32, %v2489_v34 }
  0xf0   : > { %v3338_v44 = vpop.permute.xlu0 %2497 }
  0xf1   : > { %v2500_v2 = vunpack.i.h.bf16 %v3338_v44  ;;  %v2499_v60 = vunpack.i.l.bf16 %v3338_v44  ;;  %v776_v44 = vsel %vm768_vm4, %v759_v22, %v2490_v24  ;;  %v799_v56 = vsel %vm785_vm5, %v782_v11, %v2505_v55 }
  0xf2   : > { %v3340_v63 = vpop.permute.xlu1 %2512 }
  0xf3   : > { %v2515_v37 = vunpack.i.h.bf16 %v3340_v63  ;;  %v2514_v10 = vunpack.i.l.bf16 %v3340_v63  ;;  %v798_v63 = vsel %vm785_vm5, %v781_v35, %v2504_v39  ;;  %v790_v8 = vsel %vm785_vm5, %v773_v41, %v2499_v60 }
  0xf4   : > { %v3344_v48 = vpop.permute.xlu0 %2507  ;;  %v791_v36 = vsel %vm785_vm5, %v774_v52, %v2500_v2 }
  0xf5   : > { %v2510_v23 = vunpack.i.h.bf16 %v3344_v48  ;;  %v2509_v53 = vunpack.i.l.bf16 %v3344_v48  ;;  %v800_v48 = vsel %vm785_vm5, %v783_v31, %v2514_v10  ;;  %v801_v9 = vsel %vm785_vm5, %v784_v20, %v2515_v37 }
  0xf6   : > { %v3348_v50 = vpop.permute.xlu1 %2522 }
  0xf7   : > { %v2525_v14 = vunpack.i.h.bf16 %v3348_v50  ;;  %v2524_v49 = vunpack.i.l.bf16 %v3348_v50  ;;  %v792_v50 = vsel %vm785_vm5, %v775_v45, %v2509_v53  ;;  %v793_v40 = vsel %vm785_vm5, %v776_v44, %v2510_v23 }
  0xf8   : > { %v3354_v38 = vpop.permute.xlu0 %2517 }
  0xf9   : > { %v2520_v15 = vunpack.i.h.bf16 %v3354_v38  ;;  %v2519_v47 = vunpack.i.l.bf16 %v3354_v38  ;;  %v815_v21 = vsel %vm802_vm6, %v798_v63, %v2524_v49  ;;  %v816_v7 = vsel %vm802_vm6, %v799_v56, %v2525_v14 }
  0xfa   : > { %v3360_v62 = vpop.permute.xlu1 %2532 }
  0xfb   : > { %v2535_v30 = vunpack.i.h.bf16 %v3360_v62  ;;  %v2534_v13 = vunpack.i.l.bf16 %v3360_v62  ;;  %v807_v4 = vsel %vm802_vm6, %v790_v8, %v2519_v47  ;;  %v808_v25 = vsel %vm802_vm6, %v791_v36, %v2520_v15 }
  0xfc   : > { %v3370_v17 = vpop.permute.xlu0 %2527 }
  0xfd   : > { %v2530_v0 = vunpack.i.h.bf16 %v3370_v17  ;;  %v2529_v61 = vunpack.i.l.bf16 %v3370_v17  ;;  %v817_v1 = vsel %vm802_vm6, %v800_v48, %v2534_v13  ;;  %v818_v27 = vsel %vm802_vm6, %v801_v9, %v2535_v30 }
  0xfe   : > { %v3378_v18 = vpop.permute.xlu1 %2542 }
  0xff   : > { %v2545_v38 = vunpack.i.h.bf16 %v3378_v18  ;;  %v2544_v58 = vunpack.i.l.bf16 %v3378_v18  ;;  %v809_v42 = vsel %vm802_vm6, %v792_v50, %v2529_v61  ;;  %v810_v19 = vsel %vm802_vm6, %v793_v40, %v2530_v0 }
 0x100   : > { %v2538_v57 = vpop.permute.xlu0 %2537 }
 0x101   : > { %v2540_v51 = vunpack.i.h.bf16 %v2538_v57  ;;  %v2539_v54 = vunpack.i.l.bf16 %v2538_v57  ;;  %v832_v32 = vsel %vm819_vm7, %v815_v21, %v2544_v58  ;;  %v833_v22 = vsel %vm819_vm7, %v816_v7, %v2545_v38 }
 0x102   : > { %v2553_v46 = vpop.permute.xlu1 %2552  ;;  %v2709_v58 = vmov 1983009808  }
 0x103   : > { %v2555_v62 = vunpack.i.h.bf16 %v2553_v46  ;;  %v2554_v3 = vunpack.i.l.bf16 %v2553_v46  ;;  %v824_v28 = vsel %vm819_vm7, %v807_v4, %v2539_v54  ;;  %v825_v12 = vsel %vm819_vm7, %v808_v25, %v2540_v51 }
 0x104   : > { %v3404_v59 = vpop.permute.xlu0 %2547  ;;  %v1097_v51 = vunpack.c.l.s4 %v2709_v58  ;;  %v1099_v54 = vlaneseq }
 0x105   : > { %v2549_v17 = vunpack.i.l.bf16 %v3404_v59  ;;  %v834_v35 = vsel %vm819_vm7, %v817_v1, %v2554_v3  ;;  %v835_v11 = vsel %vm819_vm7, %v818_v27, %v2555_v62  ;;  %v2550_v24 = vunpack.i.h.bf16 %v3404_v59  ;;  %v3467_v62 = vld [vmem:[%s3879_s2] ss:$0 sm:$0xff] }
 0x106   : > { %v2563_v16 = vpop.permute.xlu1 %2562  ;;  %v1098_v4 = vunpack.c.0.s8 %v1097_v51  ;;  %v1100_v25 = vshrl.u32 %v1099_v54, 7 }
 0x107   : > { %v2564_v26 = vunpack.i.l.bf16 %v2563_v16  ;;  %v2565_v33 = vunpack.i.h.bf16 %v2563_v16  ;;  %v826_v55 = vsel %vm819_vm7, %v809_v42, %v2549_v17  ;;  %v827_v48 = vsel %vm819_vm7, %v810_v19, %v2550_v24 }
 0x108   : > { %v2558_v6 = vpop.permute.xlu0 %2557 }
 0x109   : > { %v2559_v43 = vunpack.i.l.bf16 %v2558_v6  ;;  %v2560_v34 = vunpack.i.h.bf16 %v2558_v6  ;;  %v849_v39 = vsel %vm836_vm8, %v832_v32, %v2564_v26  ;;  %v850_v41 = vsel %vm836_vm8, %v833_v22, %v2565_v33 }
 0x10a   : > { %v2573_v29 = vpop.permute.xlu1 %2572 }
 0x10b   : > { %v841_v52 = vsel %vm836_vm8, %v824_v28, %v2559_v43  ;;  %v2575_v37 = vunpack.i.h.bf16 %v2573_v29  ;;  %v2574_v10 = vunpack.i.l.bf16 %v2573_v29  ;;  %v842_v45 = vsel %vm836_vm8, %v825_v12, %v2560_v34 }
 0x10c   : > { %v2568_v18 = vpop.permute.xlu0 %2567  ;;  %v3469_v29 = vsub.s32 %v1098_v4, %v1100_v25 }
 0x10d   : > { %v2570_v44 = vunpack.i.h.bf16 %v2568_v18  ;;  %v2569_v14 = vunpack.i.l.bf16 %v2568_v18  ;;  %v851_v9 = vsel %vm836_vm8, %v834_v35, %v2574_v10  ;;  %v852_v15 = vsel %vm836_vm8, %v835_v11, %v2575_v37 }
 0x10e   : > { %v2583_v57 = vpop.permute.xlu1 %2582 }
 0x10f   : > { %v2585_v2 = vunpack.i.h.bf16 %v2583_v57  ;;  %v2584_v60 = vunpack.i.l.bf16 %v2583_v57  ;;  %v843_v21 = vsel %vm836_vm8, %v826_v55, %v2569_v14  ;;  %v844_v7 = vsel %vm836_vm8, %v827_v48, %v2570_v44 }
 0x110   : > { %v2578_v46 = vpop.permute.xlu0 %2577 }
 0x111   : > { %v866_v31 = vsel %vm853_vm9, %v849_v39, %v2584_v60  ;;  %v867_v20 = vsel %vm853_vm9, %v850_v41, %v2585_v2  ;;  %v2580_v23 = vunpack.i.h.bf16 %v2578_v46  ;;  %v2579_v53 = vunpack.i.l.bf16 %v2578_v46 }
 0x112   : > { %v2118_v49 = vpack.c.bf16 %v867_v20, %v866_v31  ;;  %v2593_v59 = vpop.permute.xlu1 %2592 }
 0x113   : > { %v858_v63 = vsel %vm853_vm9, %v841_v52, %v2579_v53  ;;  %v859_v56 = vsel %vm853_vm9, %v842_v45, %v2580_v23  ;;  %v2595_v8 = vunpack.i.h.bf16 %v2593_v59  ;;  %v2594_v36 = vunpack.i.l.bf16 %v2593_v59 }
 0x114   : > { %v2106_v47 = vpack.c.bf16 %v859_v56, %v858_v63  ;;  %v2588_v16 = vpop.permute.xlu0 %2587  ;;  %2173 = vmatprep.mubr.msk.bf16.mxu1 %vm3284_vm11, %v2118_v49 }
 0x115   : > { %v868_v50 = vsel %vm853_vm9, %v851_v9, %v2594_v36  ;;  %v869_v40 = vsel %vm853_vm9, %v852_v15, %v2595_v8  ;;  %v2590_v30 = vunpack.i.h.bf16 %v2588_v16  ;;  %v2589_v13 = vunpack.i.l.bf16 %v2588_v16 }
 0x116   : > { %v2121_v0 = vpack.c.bf16 %v869_v40, %v868_v50  ;;  %2165 = vmatprep.mubr.msk.bf16.mxu0 %vm3284_vm11, %v2106_v47 }
 0x117   : > { %v860_v61 = vsel %vm853_vm9, %v843_v21, %v2589_v13  ;;  %v861_v6 = vsel %vm853_vm9, %v844_v7, %v2590_v30 }
 0x118   : > { %v2109_v38 = vpack.c.bf16 %v861_v6, %v860_v61  ;;  %2174 = vmatmul.mubr.msk.bf16.gmra.mrb[4].mxu1 %vm3284_vm11, %v2121_v0 }
 0x11a   : > { %2166 = vmatmul.mubr.msk.bf16.gmra.mrb[4].mxu0 %vm3284_vm11, %v2109_v38 }
 0x1af   : > { %v2171_v3 = vpop.f32.mrb[0].mxu1 }
 0x1b0   : > { %v1041_v1 = vadd.f32 %v2171_v3, %v3467_v62  ;;  %v1032_v27 = vpop.f32.mrb[1].mxu1 }
 0x1b1   : > { %v2163_v17 = vpop.f32.mrb[0].mxu0  ;;  %v1033_v5 = vadd.f32 %v3467_v62, %v1032_v27  ;;  %v2172_v26 = vpop.f32.mrb[2].mxu1 }
 0x1b2   : > { %v1009_v42 = vadd.f32 %v2163_v17, %v3467_v62  ;;  %v1073_v19 = vmax.f32 %v1041_v1, 0.0  ;;  %v1000_v33 = vpop.f32.mrb[1].mxu0  ;;  %v1044_v43 = vadd.f32 %v2172_v26, %v3467_v62  ;;  %v3475_v18 = vpop.f32.mrb[3].mxu1 }
 0x1b3   : > { %v1001_v32 = vadd.f32 %v3467_v62, %v1000_v33  ;;  %v1071_v22 = vmax.f32 %v1033_v5, 0.0  ;;  %v2164_v28 = vpop.f32.mrb[2].mxu0 }
 0x1b4   : > { %v1065_v12 = vmax.f32 %v1009_v42, 0.0  ;;  %v1265_v35 = vcombine.high %v1073_v19, %v1073_v19  ;;  %v1272_v11 = vrot.slane %v1073_v19, %v3469_v29  ;;  %v3480_v24 = vadd.f32 %v2164_v28, %v3467_v62  ;;  %v3482_v34 = vpop.f32.mrb[3].mxu0 }
 0x1b5   : > { %v3484_v57 = vmax.f32 %v1001_v32, 0.0  ;;  %v1231_v55 = vcombine.high %v1071_v22, %v1071_v22  ;;  %v3487_v39 = vrot.slane %v1071_v22, %v3469_v29  ;;  %v3489_v2 = vmax.f32 %v1044_v43, 0.0 }
 0x1b6   : > { %v1129_v60 = vcombine.high %v1065_v12, %v1065_v12  ;;  %v1136_v41 = vrot.slane %v1065_v12, %v3469_v29  ;;  %v1279_v52 = vrot.slane %v1265_v35, %v3469_v29  ;;  %v1280_v37 = vcombine.high %v1272_v11, %v1272_v11 }
 0x1b7   : > { %v1712_v10 = vsel %vm1431_vm12, %v1272_v11, -inf  ;;  %v1095_v46 = vcombine.high %v3484_v57, %v3484_v57  ;;  %v3498_v31 = vrot.slane %v3484_v57, %v3469_v29  ;;  %v3501_v20 = vrot.slane %v1231_v55, %v3469_v29 }
 0x1b8   : > { %v1143_v23 = vrot.slane %v1129_v60, %v3469_v29  ;;  %v1144_v53 = vcombine.high %v1136_v41, %v1136_v41  ;;  %v1488_v45 = vsel %vm1431_vm12, %v1136_v41, -inf  ;;  %v1281_v44 = vcombine.high %v1279_v52, %v1279_v52 }
 0x1b9   : > { %v1489_v14 = vrot.slane %v1488_v45, 4  ;;  %v1713_v49 = vrot.slane %v1712_v10, 4  ;;  %v1719_v59 = vsel %vm1431_vm12, %v1280_v37, -inf  ;;  %v1726_v63 = vsel %vm1431_vm12, %v1279_v52, -inf }
 0x1ba   : > { %v1145_v56 = vcombine.high %v1143_v23, %v1143_v23  ;;  %v1495_v8 = vsel %vm1431_vm12, %v1144_v53, -inf  ;;  %v1502_v36 = vsel %vm1431_vm12, %v1143_v23, -inf  ;;  %v1720_v48 = vrot.slane %v1719_v59, 4 }
 0x1bb   : > { %v1490_v9 = vmax.f32 %v1488_v45, %v1489_v14  ;;  %v1496_v15 = vrot.slane %v1495_v8, 4  ;;  %v1503_v47 = vrot.slane %v1502_v36, 4  ;;  %v1714_v16 = vmax.f32 %v1712_v10, %v1713_v49 }
 0x1bc   : > { %v1509_v50 = vsel %vm1431_vm12, %v1145_v56, -inf  ;;  %v1721_v40 = vmax.f32 %v1719_v59, %v1720_v48  ;;  %v1727_v30 = vrot.slane %v1726_v63, 4  ;;  %v1733_v13 = vsel %vm1431_vm12, %v1281_v44, -inf }
 0x1bd   : > { %v1491_v21 = vrot.slane %v1490_v9, 2  ;;  %v1497_v7 = vmax.f32 %v1495_v8, %v1496_v15  ;;  %v1504_v0 = vmax.f32 %v1502_v36, %v1503_v47  ;;  %v1510_v61 = vrot.slane %v1509_v50, 4 }
 0x1be   : > { %v1715_v6 = vrot.slane %v1714_v16, 2  ;;  %v1722_v38 = vrot.slane %v1721_v40, 2  ;;  %v1728_v58 = vmax.f32 %v1726_v63, %v1727_v30  ;;  %v1734_v51 = vrot.slane %v1733_v13, 4 }
 0x1bf   : > { %v1492_v54 = vmax.f32 %v1490_v9, %v1491_v21  ;;  %v1498_v4 = vrot.slane %v1497_v7, 2  ;;  %v1505_v25 = vrot.slane %v1504_v0, 2  ;;  %v1511_v3 = vmax.f32 %v1509_v50, %v1510_v61 }
 0x1c0   : > { %v1716_v1 = vmax.f32 %v1714_v16, %v1715_v6  ;;  %v1723_v27 = vmax.f32 %v1721_v40, %v1722_v38  ;;  %v1729_v17 = vrot.slane %v1728_v58, 2  ;;  %v1735_v5 = vmax.f32 %v1733_v13, %v1734_v51 }
 0x1c1   : > { %v1493_v26 = vrot.slane %v1492_v54, 1  ;;  %v1499_v42 = vmax.f32 %v1497_v7, %v1498_v4  ;;  %v1506_v19 = vmax.f32 %v1504_v0, %v1505_v25  ;;  %v1512_v33 = vrot.slane %v1511_v3, 2 }
 0x1c2   : > { %v1717_v43 = vrot.slane %v1716_v1, 1  ;;  %v1724_v32 = vrot.slane %v1723_v27, 1  ;;  %v1730_v22 = vmax.f32 %v1728_v58, %v1729_v17  ;;  %v1736_v28 = vrot.slane %v1735_v5, 2 }
 0x1c3   : > { %v3511_v12 = vmax.f32 %v1492_v54, %v1493_v26  ;;  %v1500_v35 = vrot.slane %v1499_v42, 1  ;;  %v1507_v11 = vrot.slane %v1506_v19, 1  ;;  %v1513_v57 = vmax.f32 %v1511_v3, %v1512_v33 }
 0x1c4   : > { %v3513_v55 = vmax.f32 %v1716_v1, %v1717_v43  ;;  %v3515_v60 = vmax.f32 %v1723_v27, %v1724_v32  ;;  %v1731_v41 = vrot.slane %v1730_v22, 1  ;;  %v1737_v52 = vmax.f32 %v1735_v5, %v1736_v28 }
 0x1c5   : > { %v3517_v37 = vmax.f32 %v1499_v42, %v1500_v35  ;;  %v3519_v10 = vmax.f32 %v1506_v19, %v1507_v11  ;;  %v1514_v23 = vrot.slane %v1513_v57, 1  ;;  %v1109_v53 = vrot.slane %v1095_v46, %v3469_v29 }
 0x1c6   : > { %v3522_v45 = vmax.f32 %v1730_v22, %v1731_v41  ;;  %v1738_v44 = vrot.slane %v1737_v52, 1  ;;  %v1110_v14 = vcombine.high %v3498_v31, %v3498_v31  ;;  %v1432_v49 = vsel %vm1431_vm12, %v3498_v31, -inf }
 0x1c7   : > { %v3528_v59 = vmax.f32 %v1513_v57, %v1514_v23  ;;  %v1111_v63 = vcombine.high %v1109_v53, %v1109_v53  ;;  %v1433_v56 = vrot.slane %v1432_v49, 4  ;;  %v1446_v8 = vsel %vm1431_vm12, %v1109_v53, -inf }
 0x1c8   : > { %v3531_v36 = vmax.f32 %v1737_v52, %v1738_v44  ;;  %v1439_v48 = vsel %vm1431_vm12, %v1110_v14, -inf  ;;  %v1447_v46 = vrot.slane %v1446_v8, 4  ;;  %v1246_v9 = vcombine.high %v3487_v39, %v3487_v39 }
 0x1c9   : > { %v1434_v15 = vmax.f32 %v1432_v49, %v1433_v56  ;;  %v1440_v47 = vrot.slane %v1439_v48, 4  ;;  %v1453_v16 = vsel %vm1431_vm12, %v1111_v63, -inf  ;;  %v1247_v31 = vcombine.high %v3501_v20, %v3501_v20 }
 0x1ca   : > { %v1448_v50 = vmax.f32 %v1446_v8, %v1447_v46  ;;  %v1454_v40 = vrot.slane %v1453_v16, 4  ;;  %v1656_v30 = vsel %vm1431_vm12, %v3487_v39, -inf  ;;  %v1663_v13 = vsel %vm1431_vm12, %v1246_v9, -inf }
 0x1cb   : > { %v1435_v21 = vrot.slane %v1434_v15, 2  ;;  %v1441_v7 = vmax.f32 %v1439_v48, %v1440_v47  ;;  %v1657_v0 = vrot.slane %v1656_v30, 4  ;;  %v1664_v61 = vrot.slane %v1663_v13, 4 }
 0x1cc   : > { %v1449_v6 = vrot.slane %v1448_v50, 2  ;;  %v1455_v38 = vmax.f32 %v1453_v16, %v1454_v40  ;;  %v1670_v58 = vsel %vm1431_vm12, %v3501_v20, -inf  ;;  %v1677_v51 = vsel %vm1431_vm12, %v1247_v31, -inf }
 0x1cd   : > { %v1436_v54 = vmax.f32 %v1434_v15, %v1435_v21  ;;  %v1442_v4 = vrot.slane %v1441_v7, 2  ;;  %v1658_v25 = vmax.f32 %v1656_v30, %v1657_v0  ;;  %v1665_v3 = vmax.f32 %v1663_v13, %v1664_v61 }
 0x1ce   : > { %v1450_v39 = vmax.f32 %v1448_v50, %v1449_v6  ;;  %v1456_v1 = vrot.slane %v1455_v38, 2  ;;  %v1671_v27 = vrot.slane %v1670_v58, 4  ;;  %v1678_v17 = vrot.slane %v1677_v51, 4 }
 0x1cf   : > { %v1437_v5 = vrot.slane %v1436_v54, 1  ;;  %v1443_v26 = vmax.f32 %v1441_v7, %v1442_v4  ;;  %v1659_v42 = vrot.slane %v1658_v25, 2  ;;  %v1666_v19 = vrot.slane %v1665_v3, 2 }
 0x1d0   : > { %v1451_v33 = vrot.slane %v1450_v39, 1  ;;  %v1457_v43 = vmax.f32 %v1455_v38, %v1456_v1  ;;  %v1672_v32 = vmax.f32 %v1670_v58, %v1671_v27  ;;  %v1679_v22 = vmax.f32 %v1677_v51, %v1678_v17 }
 0x1d1   : > { %v1438_v20 = vmax.f32 %v1436_v54, %v1437_v5  ;;  %v1444_v28 = vrot.slane %v1443_v26, 1  ;;  %v1660_v35 = vmax.f32 %v1658_v25, %v1659_v42  ;;  %v1667_v11 = vmax.f32 %v1665_v3, %v1666_v19 }
 0x1d2   : > { %v1452_v57 = vmax.f32 %v1450_v39, %v1451_v33  ;;  %v1458_v41 = vrot.slane %v1457_v43, 1  ;;  %v1673_v52 = vrot.slane %v1672_v32, 2  ;;  %v1680_v23 = vrot.slane %v1679_v22, 2 }
 0x1d3   : > { %v1445_v53 = vmax.f32 %v1443_v26, %v1444_v28  ;;  %v1880_v44 = vmax.f32 %v1438_v20, %v3511_v12  ;;  %v1661_v14 = vrot.slane %v1660_v35, 1  ;;  %v1668_v49 = vrot.slane %v1667_v11, 1 }
 0x1d4   : > { %v3546_v63 = vmax.f32 %v1457_v43, %v1458_v41  ;;  %v1882_v56 = vmax.f32 %v1452_v57, %v3519_v10  ;;  %v1674_v8 = vmax.f32 %v1672_v32, %v1673_v52  ;;  %v1681_v48 = vmax.f32 %v1679_v22, %v1680_v23 }
 0x1d5   : > { %v1881_v46 = vmax.f32 %v1445_v53, %v3517_v37  ;;  %v1662_v9 = vmax.f32 %v1660_v35, %v1661_v14  ;;  %v1669_v15 = vmax.f32 %v1667_v11, %v1668_v49  ;;  %v1066_v47 = vmax.f32 %v3480_v24, 0.0 }
 0x1d6   : > { %v1883_v16 = vmax.f32 %v3546_v63, %v3528_v59  ;;  %v1675_v31 = vrot.slane %v1674_v8, 1  ;;  %v1682_v50 = vrot.slane %v1681_v48, 1  ;;  %v1282_v12 = vcombine.high %v3489_v2, %v3489_v2 }
 0x1d7   : > { %v1945_v40 = vsel %vm1944_vm13, %v1881_v46, %v1880_v44  ;;  %v1896_v10 = vmax.f32 %v1662_v9, %v3513_v55  ;;  %v1897_v30 = vmax.f32 %v1669_v15, %v3515_v60  ;;  %v1146_v13 = vcombine.high %v1066_v47, %v1066_v47 }
 0x1d8   : > { %v3559_v37 = vsel %vm1946_vm14, %v1882_v56, %v1945_v40  ;;  %v1676_v21 = vmax.f32 %v1674_v8, %v1675_v31  ;;  %v3561_v24 = vmax.f32 %v1681_v48, %v1682_v50  ;;  %v1153_v7 = vrot.slane %v1066_v47, %v3469_v29 }
 0x1d9   : > { %v1965_v0 = vsel %vm1944_vm13, %v1897_v30, %v1896_v10  ;;  %v1160_v61 = vrot.slane %v1146_v13, %v3469_v29  ;;  %v1289_v6 = vrot.slane %v3489_v2, %v3469_v29  ;;  %v1296_v55 = vrot.slane %v1282_v12, %v3469_v29 }
 0x1da   : > { %v1898_v60 = vmax.f32 %v1676_v21, %v3522_v45  ;;  %v1899_v38 = vmax.f32 %v3561_v24, %v3531_v36  ;;  %v1161_v58 = vcombine.high %v1153_v7, %v1153_v7  ;;  %v1516_v51 = vsel %vm1431_vm12, %v1153_v7, -inf }
 0x1db   : > { %v1162_v54 = vcombine.high %v1160_v61, %v1160_v61  ;;  %v1517_v4 = vrot.slane %v1516_v51, 4  ;;  %v1530_v25 = vsel %vm1431_vm12, %v1160_v61, -inf  ;;  %v1297_v3 = vcombine.high %v1289_v6, %v1289_v6 }
 0x1dc   : > { %v1966_v39 = vsel %vm1946_vm14, %v1898_v60, %v1965_v0  ;;  %v1523_v1 = vsel %vm1431_vm12, %v1161_v58, -inf  ;;  %v1531_v2 = vrot.slane %v1530_v25, 4  ;;  %v1298_v27 = vcombine.high %v1296_v55, %v1296_v55 }
 0x1dd   : > { %v1518_v17 = vmax.f32 %v1516_v51, %v1517_v4  ;;  %v1524_v5 = vrot.slane %v1523_v1, 4  ;;  %v1537_v45 = vsel %vm1431_vm12, %v1162_v54, -inf  ;;  %v1740_v26 = vsel %vm1431_vm12, %v1289_v6, -inf }
 0x1de   : > { %v1532_v42 = vmax.f32 %v1530_v25, %v1531_v2  ;;  %v1538_v19 = vrot.slane %v1537_v45, 4  ;;  %v1741_v33 = vrot.slane %v1740_v26, 4  ;;  %v1747_v43 = vsel %vm1431_vm12, %v1297_v3, -inf }
 0x1df   : > { %v1519_v32 = vrot.slane %v1518_v17, 2  ;;  %v1525_v22 = vmax.f32 %v1523_v1, %v1524_v5  ;;  %v1748_v20 = vrot.slane %v1747_v43, 4  ;;  %v1754_v28 = vsel %vm1431_vm12, %v1296_v55, -inf }
 0x1e0   : > { %v1533_v35 = vrot.slane %v1532_v42, 2  ;;  %v1539_v11 = vmax.f32 %v1537_v45, %v1538_v19  ;;  %v1742_v57 = vmax.f32 %v1740_v26, %v1741_v33  ;;  %v1755_v41 = vrot.slane %v1754_v28, 4 }
 0x1e1   : > { %v1520_v52 = vmax.f32 %v1518_v17, %v1519_v32  ;;  %v1526_v23 = vrot.slane %v1525_v22, 2  ;;  %v1749_v53 = vmax.f32 %v1747_v43, %v1748_v20  ;;  %v1761_v44 = vsel %vm1431_vm12, %v1298_v27, -inf }
 0x1e2   : > { %v1534_v14 = vmax.f32 %v1532_v42, %v1533_v35  ;;  %v1540_v49 = vrot.slane %v1539_v11, 2  ;;  %v1743_v56 = vrot.slane %v1742_v57, 2  ;;  %v1756_v8 = vmax.f32 %v1754_v28, %v1755_v41 }
 0x1e3   : > { %v1527_v48 = vmax.f32 %v1525_v22, %v1526_v23  ;;  %v1750_v46 = vrot.slane %v1749_v53, 2  ;;  %v1762_v9 = vrot.slane %v1761_v44, 4  ;;  %v1521_v15 = vrot.slane %v1520_v52, 1 }
 0x1e4   : > { %v1541_v47 = vmax.f32 %v1539_v11, %v1540_v49  ;;  %v1744_v31 = vmax.f32 %v1742_v57, %v1743_v56  ;;  %v1757_v50 = vrot.slane %v1756_v8, 2  ;;  %v1535_v12 = vrot.slane %v1534_v14, 1 }
 0x1e5   : > { %v1751_v40 = vmax.f32 %v1749_v53, %v1750_v46  ;;  %v1763_v10 = vmax.f32 %v1761_v44, %v1762_v9  ;;  %v1036_v30 = vadd.f32 %v3467_v62, %v3475_v18  ;;  %v1528_v13 = vrot.slane %v1527_v48, 1 }
 0x1e6   : > { %v1542_v21 = vrot.slane %v1541_v47, 1  ;;  %v1745_v7 = vrot.slane %v1744_v31, 1  ;;  %v1758_v0 = vmax.f32 %v1756_v8, %v1757_v50  ;;  %v1004_v6 = vadd.f32 %v3467_v62, %v3482_v34 }
 0x1e7   : > { %v1764_v61 = vrot.slane %v1763_v10, 2  ;;  %v3585_v55 = vmax.f32 %v1520_v52, %v1521_v15  ;;  %v1752_v60 = vrot.slane %v1751_v40, 1  ;;  %v3592_v51 = vsel %vm1948_vm15, %v1883_v16, %v3559_v37 }
 0x1e8   : > { %v1759_v58 = vrot.slane %v1758_v0, 1  ;;  %v3594_v18 = vmax.f32 %v1534_v14, %v1535_v12  ;;  %v1064_v4 = vmax.f32 %v1004_v6, 0.0  ;;  %v1072_v25 = vmax.f32 %v1036_v30, 0.0 }
 0x1e9   : > { %v1765_v54 = vmax.f32 %v1763_v10, %v1764_v61  ;;  %v3596_v3 = vmax.f32 %v1527_v48, %v1528_v13  ;;  %v3598_v1 = vmax.f32 %v1541_v47, %v1542_v21  ;;  %v3600_v34 = vmax.f32 %v1744_v31, %v1745_v7 }
 0x1ea   : > { %v3606_v2 = vsel %vm1948_vm15, %v1899_v38, %v1966_v39  ;;  %v1112_v63 = vcombine.high %v1064_v4, %v1064_v4  ;;  %v1119_v16 = vrot.slane %v1064_v4, %v3469_v29  ;;  %v1248_v37 = vcombine.high %v1072_v25, %v1072_v25 }
 0x1eb   : > { %v1766_v59 = vrot.slane %v1765_v54, 1  ;;  %v2175_v27 = vpop.f32.mrb[4].mxu1  ;;  %v3609_v17 = vmax.f32 %v1751_v40, %v1752_v60  ;;  %v3611_v5 = vmax.f32 %v1758_v0, %v1759_v58  ;;  %v1255_v45 = vrot.slane %v1072_v25, %v3469_v29 }
 0x1ec   : > { %v3615_v26 = vadd.f32 %v2175_v27, %v3467_v62  ;;  %v3617_v42 = vpop.f32.mrb[5].mxu1  ;;  %v1126_v24 = vrot.slane %v1112_v63, %v3469_v29  ;;  %v1127_v38 = vcombine.high %v1119_v16, %v1119_v16  ;;  %v1460_v39 = vsel %vm1431_vm12, %v1119_v16, -inf }
 0x1ed   : > { %v3619_v36 = vmax.f32 %v1765_v54, %v1766_v59  ;;  %v3623_v19 = vpop.f32.mrb[4].mxu0  ;;  %v3625_v33 = vpop.f32.mrb[6].mxu1  ;;  %v1461_v43 = vrot.slane %v1460_v39, 4  ;;  %v1262_v32 = vrot.slane %v1248_v37, %v3469_v29  ;;  %v1263_v22 = vcombine.high %v1255_v45, %v1255_v45 }
 0x1ee   : > { %v1684_v20 = vsel %vm1431_vm12, %v1255_v45, -inf  ;;  %v3629_v28 = vpop.f32.mrb[5].mxu0  ;;  %v3631_v35 = vpop.f32.mrb[7].mxu1  ;;  %v1128_v11 = vcombine.high %v1126_v24, %v1126_v24  ;;  %v1467_v57 = vsel %vm1431_vm12, %v1127_v38, -inf  ;;  %v1474_v41 = vsel %vm1431_vm12, %v1126_v24, -inf }
 0x1ef   : > { %v1685_v52 = vrot.slane %v1684_v20, 4  ;;  %v3635_v23 = vpop.f32.mrb[6].mxu0  ;;  %v1462_v53 = vmax.f32 %v1460_v39, %v1461_v43  ;;  %v1468_v44 = vrot.slane %v1467_v57, 4  ;;  %v1475_v14 = vrot.slane %v1474_v41, 4 }
 0x1f0   : > { %v1264_v49 = vcombine.high %v1262_v32, %v1262_v32  ;;  %v3637_v56 = vpop.f32.mrb[7].mxu0  ;;  %v1481_v8 = vsel %vm1431_vm12, %v1128_v11, -inf  ;;  %v1691_v46 = vsel %vm1431_vm12, %v1263_v22, -inf  ;;  %v1698_v9 = vsel %vm1431_vm12, %v1262_v32, -inf }
 0x1f1   : > { %v1686_v48 = vmax.f32 %v1684_v20, %v1685_v52  ;;  %v1463_v15 = vrot.slane %v1462_v53, 2  ;;  %v1469_v47 = vmax.f32 %v1467_v57, %v1468_v44  ;;  %v1476_v31 = vmax.f32 %v1474_v41, %v1475_v14 }
 0x1f2   : > { %v1482_v50 = vrot.slane %v1481_v8, 4  ;;  %v1692_v40 = vrot.slane %v1691_v46, 4  ;;  %v1699_v10 = vrot.slane %v1698_v9, 4  ;;  %v1705_v30 = vsel %vm1431_vm12, %v1264_v49, -inf }
 0x1f3   : > { %v1687_v12 = vrot.slane %v1686_v48, 2  ;;  %v1464_v13 = vmax.f32 %v1462_v53, %v1463_v15  ;;  %v1470_v21 = vrot.slane %v1469_v47, 2  ;;  %v1477_v7 = vrot.slane %v1476_v31, 2 }
 0x1f4   : > { %v1483_v0 = vmax.f32 %v1481_v8, %v1482_v50  ;;  %v1693_v6 = vmax.f32 %v1691_v46, %v1692_v40  ;;  %v1700_v60 = vmax.f32 %v1698_v9, %v1699_v10  ;;  %v1706_v58 = vrot.slane %v1705_v30, 4 }
 0x1f5   : > { %v1688_v61 = vmax.f32 %v1686_v48, %v1687_v12  ;;  %v1465_v54 = vrot.slane %v1464_v13, 1  ;;  %v1471_v4 = vmax.f32 %v1469_v47, %v1470_v21  ;;  %v1478_v25 = vmax.f32 %v1476_v31, %v1477_v7 }
 0x1f6   : > { %v1484_v59 = vrot.slane %v1483_v0, 2  ;;  %v1694_v16 = vrot.slane %v1693_v6, 2  ;;  %v1701_v37 = vrot.slane %v1700_v60, 2  ;;  %v1707_v27 = vmax.f32 %v1705_v30, %v1706_v58 }
 0x1f7   : > { %v1689_v63 = vrot.slane %v1688_v61, 1  ;;  %v1466_v45 = vmax.f32 %v1464_v13, %v1465_v54  ;;  %v1472_v24 = vrot.slane %v1471_v4, 1  ;;  %v1479_v38 = vrot.slane %v1478_v25, 1 }
 0x1f8   : > { %v1485_v39 = vmax.f32 %v1483_v0, %v1484_v59  ;;  %v1695_v32 = vmax.f32 %v1693_v6, %v1694_v16  ;;  %v1702_v22 = vmax.f32 %v1700_v60, %v1701_v37  ;;  %v1708_v20 = vrot.slane %v1707_v27, 2 }
 0x1f9   : > { %v1690_v43 = vmax.f32 %v1688_v61, %v1689_v63  ;;  %v1473_v11 = vmax.f32 %v1471_v4, %v1472_v24  ;;  %v1480_v57 = vmax.f32 %v1478_v25, %v1479_v38  ;;  %v1884_v52 = vmax.f32 %v1466_v45, %v3585_v55 }
 0x1fa   : > { %v1486_v41 = vrot.slane %v1485_v39, 1  ;;  %v1696_v53 = vrot.slane %v1695_v32, 1  ;;  %v1703_v44 = vrot.slane %v1702_v22, 1  ;;  %v1709_v14 = vmax.f32 %v1707_v27, %v1708_v20 }
 0x1fb   : > { %v1900_v49 = vmax.f32 %v1690_v43, %v3600_v34  ;;  %v1885_v48 = vmax.f32 %v1473_v11, %v3596_v3  ;;  %v1886_v46 = vmax.f32 %v1480_v57, %v3594_v18  ;;  %v1951_v9 = vsel %vm1950_vm0, %v1884_v52, %v3592_v51 }
 0x1fc   : > { %v1487_v8 = vmax.f32 %v1485_v39, %v1486_v41  ;;  %v1697_v15 = vmax.f32 %v1695_v32, %v1696_v53  ;;  %v1704_v47 = vmax.f32 %v1702_v22, %v1703_v44  ;;  %v1710_v31 = vrot.slane %v1709_v14, 1 }
 0x1fd   : > { %v1968_v55 = vsel %vm1950_vm0, %v1900_v49, %v3606_v2  ;;  %v1953_v34 = vsel %vm1952_vm1, %v1885_v48, %v1951_v9  ;;  %v1025_v12 = vadd.f32 %v3623_v19, %v3467_v62  ;;  %v1077_v3 = vmax.f32 %v3615_v26, 0.0 }
 0x1fe   : > { %v1887_v50 = vmax.f32 %v1487_v8, %v3598_v1  ;;  %v1955_v18 = vsel %vm1954_vm2, %v1886_v46, %v1953_v34  ;;  %v1711_v40 = vmax.f32 %v1709_v14, %v1710_v31  ;;  %v1901_v51 = vmax.f32 %v1697_v15, %v3609_v17 }
 0x1ff   : > { %v1902_v10 = vmax.f32 %v1704_v47, %v3611_v5  ;;  %v1069_v13 = vmax.f32 %v1025_v12, 0.0  ;;  %v1333_v2 = vcombine.high %v1077_v3, %v1077_v3  ;;  %v1340_v1 = vrot.slane %v1077_v3, %v3469_v29 }
 0x200   : > { %v1957_v30 = vsel %vm1956_vm3, %v1887_v50, %v1955_v18  ;;  %v1903_v21 = vmax.f32 %v1711_v40, %v3619_v36  ;;  %v1969_v7 = vsel %vm1952_vm1, %v1901_v51, %v1968_v55  ;;  %v1017_v26 = vadd.f32 %v3467_v62, %v3629_v28 }
 0x201   : > { %v3670_v19 = vadd.f32 %v3467_v62, %v3617_v42  ;;  %1983 = vst [vmem:[%s3672_s5] sm:$0xff] %v1957_v30  ;;  %v1970_v17 = vsel %vm1954_vm2, %v1902_v10, %v1969_v7  ;;  %v1197_v5 = vcombine.high %v1069_v13, %v1069_v13  ;;  %v1204_v0 = vrot.slane %v1069_v13, %v3469_v29 }
 0x202   : > { %v1347_v36 = vrot.slane %v1333_v2, %v3469_v29  ;;  %v1971_v61 = vsel %vm1956_vm3, %v1903_v21, %v1970_v17  ;;  %v1348_v6 = vcombine.high %v1340_v1, %v1340_v1  ;;  %v1824_v28 = vsel %vm1431_vm12, %v1340_v1, -inf }
 0x203   : > { %v3680_v60 = vmax.f32 %v1017_v26, 0.0  ;;  %v1211_v42 = vrot.slane %v1197_v5, %v3469_v29  ;;  %v1212_v58 = vcombine.high %v1204_v0, %v1204_v0  ;;  %v1600_v54 = vsel %vm1431_vm12, %v1204_v0, -inf  ;;  %1985 = vst [vmem:[%s3672_s5 + $0x10] sm:$0xff] %v1971_v61 }
 0x204   : > { %v1349_v4 = vcombine.high %v1347_v36, %v1347_v36  ;;  %v1601_v25 = vrot.slane %v1600_v54, 4  ;;  %v1825_v59 = vrot.slane %v1824_v28, 4  ;;  %v1831_v63 = vsel %vm1431_vm12, %v1348_v6, -inf }
 0x205   : > { %v1838_v16 = vsel %vm1431_vm12, %v1347_v36, -inf  ;;  %v1213_v37 = vcombine.high %v1211_v42, %v1211_v42  ;;  %v1607_v27 = vsel %vm1431_vm12, %v1212_v58, -inf  ;;  %v1614_v45 = vsel %vm1431_vm12, %v1211_v42, -inf }
 0x206   : > { %v1832_v24 = vrot.slane %v1831_v63, 4  ;;  %v1602_v38 = vmax.f32 %v1600_v54, %v1601_v25  ;;  %v1608_v39 = vrot.slane %v1607_v27, 4  ;;  %v1615_v43 = vrot.slane %v1614_v45, 4 }
 0x207   : > { %v1826_v32 = vmax.f32 %v1824_v28, %v1825_v59  ;;  %v1621_v22 = vsel %vm1431_vm12, %v1213_v37, -inf  ;;  %v1839_v11 = vrot.slane %v1838_v16, 4  ;;  %v1845_v57 = vsel %vm1431_vm12, %v1349_v4, -inf }
 0x208   : > { %v1833_v20 = vmax.f32 %v1831_v63, %v1832_v24  ;;  %v1603_v41 = vrot.slane %v1602_v38, 2  ;;  %v1609_v52 = vmax.f32 %v1607_v27, %v1608_v39  ;;  %v1616_v53 = vmax.f32 %v1614_v45, %v1615_v43 }
 0x209   : > { %v1622_v44 = vrot.slane %v1621_v22, 4  ;;  %v1827_v14 = vrot.slane %v1826_v32, 2  ;;  %v1840_v8 = vmax.f32 %v1838_v16, %v1839_v11  ;;  %v1846_v48 = vrot.slane %v1845_v57, 4 }
 0x20a   : > { %v1834_v49 = vrot.slane %v1833_v20, 2  ;;  %v1604_v46 = vmax.f32 %v1602_v38, %v1603_v41  ;;  %v1610_v9 = vrot.slane %v1609_v52, 2  ;;  %v1617_v15 = vrot.slane %v1616_v53, 2 }
 0x20b   : > { %v1623_v47 = vmax.f32 %v1621_v22, %v1622_v44  ;;  %v1828_v31 = vmax.f32 %v1826_v32, %v1827_v14  ;;  %v1841_v50 = vrot.slane %v1840_v8, 2  ;;  %v1847_v34 = vmax.f32 %v1845_v57, %v1846_v48 }
 0x20c   : > { %v1835_v55 = vmax.f32 %v1833_v20, %v1834_v49  ;;  %v1605_v12 = vrot.slane %v1604_v46, 1  ;;  %v1611_v3 = vmax.f32 %v1609_v52, %v1610_v9  ;;  %v1618_v18 = vmax.f32 %v1616_v53, %v1617_v15 }
 0x20d   : > { %v1624_v40 = vrot.slane %v1623_v47, 2  ;;  %v1829_v51 = vrot.slane %v1828_v31, 1  ;;  %v1842_v30 = vmax.f32 %v1840_v8, %v1841_v50  ;;  %v1848_v13 = vrot.slane %v1847_v34, 2 }
 0x20e   : > { %v1836_v10 = vrot.slane %v1835_v55, 1  ;;  %v3691_v2 = vmax.f32 %v1604_v46, %v1605_v12  ;;  %v1612_v1 = vrot.slane %v1611_v3, 1  ;;  %v1619_v21 = vrot.slane %v1618_v18, 1 }
 0x20f   : > { %v1625_v7 = vmax.f32 %v1623_v47, %v1624_v40  ;;  %v3693_v26 = vmax.f32 %v1828_v31, %v1829_v51  ;;  %v1843_v5 = vrot.slane %v1842_v30, 1  ;;  %v1849_v0 = vmax.f32 %v1847_v34, %v1848_v13 }
 0x210   : > { %v3695_v17 = vmax.f32 %v1835_v55, %v1836_v10  ;;  %v3697_v36 = vmax.f32 %v1611_v3, %v1612_v1  ;;  %v3699_v61 = vmax.f32 %v1618_v18, %v1619_v21  ;;  %v1163_v28 = vcombine.high %v3680_v60, %v3680_v60 }
 0x211   : > { %v1626_v6 = vrot.slane %v1625_v7, 1  ;;  %v3703_v42 = vmax.f32 %v1842_v30, %v1843_v5  ;;  %v1850_v58 = vrot.slane %v1849_v0, 1  ;;  %v1170_v54 = vrot.slane %v3680_v60, %v3469_v29 }
 0x212   : > { %v1075_v4 = vmax.f32 %v3670_v19, 0.0  ;;  %v1177_v59 = vrot.slane %v1163_v28, %v3469_v29  ;;  %v1028_v63 = vadd.f32 %v3635_v23, %v3467_v62  ;;  %v3715_v16 = vadd.f32 %v3625_v33, %v3467_v62 }
 0x213   : > { %v3708_v25 = vmax.f32 %v1625_v7, %v1626_v6  ;;  %v3717_v37 = vmax.f32 %v1849_v0, %v1850_v58  ;;  %v1178_v27 = vcombine.high %v1170_v54, %v1170_v54  ;;  %v1544_v45 = vsel %vm1431_vm12, %v1170_v54, -inf }
 0x214   : > { %v1299_v24 = vcombine.high %v1075_v4, %v1075_v4  ;;  %v1179_v60 = vcombine.high %v1177_v59, %v1177_v59  ;;  %v1545_v38 = vrot.slane %v1544_v45, 4  ;;  %v1558_v19 = vsel %vm1431_vm12, %v1177_v59, -inf }
 0x215   : > { %v1306_v39 = vrot.slane %v1075_v4, %v3469_v29  ;;  %v1551_v43 = vsel %vm1431_vm12, %v1178_v27, -inf  ;;  %v1559_v32 = vrot.slane %v1558_v19, 4  ;;  %v1070_v22 = vmax.f32 %v1028_v63, 0.0 }
 0x216   : > { %v1313_v23 = vrot.slane %v1299_v24, %v3469_v29  ;;  %v1546_v62 = vmax.f32 %v1544_v45, %v1545_v38  ;;  %v1552_v33 = vrot.slane %v1551_v43, 4  ;;  %v1565_v20 = vsel %vm1431_vm12, %v1179_v60, -inf }
 0x217   : > { %v1314_v11 = vcombine.high %v1306_v39, %v1306_v39  ;;  %v1560_v57 = vmax.f32 %v1558_v19, %v1559_v32  ;;  %v1566_v41 = vrot.slane %v1565_v20, 4  ;;  %v1768_v53 = vsel %vm1431_vm12, %v1306_v39, -inf }
 0x218   : > { %v1315_v52 = vcombine.high %v1313_v23, %v1313_v23  ;;  %v1547_v44 = vrot.slane %v1546_v62, 2  ;;  %v1553_v14 = vmax.f32 %v1551_v43, %v1552_v33  ;;  %v1769_v49 = vrot.slane %v1768_v53, 4 }
 0x219   : > { %v1775_v8 = vsel %vm1431_vm12, %v1314_v11, -inf  ;;  %v1561_v48 = vrot.slane %v1560_v57, 2  ;;  %v1567_v46 = vmax.f32 %v1565_v20, %v1566_v41  ;;  %v1782_v15 = vsel %vm1431_vm12, %v1313_v23, -inf }
 0x21a   : > { %v1776_v9 = vrot.slane %v1775_v8, 4  ;;  %v1548_v47 = vmax.f32 %v1546_v62, %v1547_v44  ;;  %v1554_v31 = vrot.slane %v1553_v14, 2  ;;  %v1770_v55 = vmax.f32 %v1768_v53, %v1769_v49 }
 0x21b   : > { %v1783_v50 = vrot.slane %v1782_v15, 4  ;;  %v1562_v34 = vmax.f32 %v1560_v57, %v1561_v48  ;;  %v1568_v12 = vrot.slane %v1567_v46, 2  ;;  %v1789_v18 = vsel %vm1431_vm12, %v1315_v52, -inf }
 0x21c   : > { %v1777_v3 = vmax.f32 %v1775_v8, %v1776_v9  ;;  %v1549_v40 = vrot.slane %v1548_v47, 1  ;;  %v1555_v51 = vmax.f32 %v1553_v14, %v1554_v31  ;;  %v1771_v10 = vrot.slane %v1770_v55, 2 }
 0x21d   : > { %v1784_v30 = vmax.f32 %v1782_v15, %v1783_v50  ;;  %v1563_v13 = vrot.slane %v1562_v34, 1  ;;  %v1569_v1 = vmax.f32 %v1567_v46, %v1568_v12  ;;  %v1790_v7 = vrot.slane %v1789_v18, 4 }
 0x21e   : > { %v1778_v21 = vrot.slane %v1777_v3, 2  ;;  %v1550_v5 = vmax.f32 %v1548_v47, %v1549_v40  ;;  %v1556_v0 = vrot.slane %v1555_v51, 1  ;;  %v1772_v6 = vmax.f32 %v1770_v55, %v1771_v10 }
 0x21f   : > { %v1785_v28 = vrot.slane %v1784_v30, 2  ;;  %v1564_v58 = vmax.f32 %v1562_v34, %v1563_v13  ;;  %v1570_v54 = vrot.slane %v1569_v1, 1  ;;  %v1791_v59 = vmax.f32 %v1789_v18, %v1790_v7  ;;  %v2604_v18 = vld [vmem:[%s3879_s2] ss:$0 sm:$0xff] }
 0x220   : > { %v1779_v4 = vmax.f32 %v1777_v3, %v1778_v21  ;;  %v1557_v63 = vmax.f32 %v1555_v51, %v1556_v0  ;;  %v1888_v27 = vmax.f32 %v1550_v5, %v3691_v2  ;;  %v1773_v45 = vrot.slane %v1772_v6, 1 }
 0x221   : > { %v1786_v24 = vmax.f32 %v1784_v30, %v1785_v28  ;;  %v1571_v60 = vmax.f32 %v1569_v1, %v1570_v54  ;;  %v1890_v38 = vmax.f32 %v1564_v58, %v3699_v61  ;;  %v1792_v39 = vrot.slane %v1791_v59, 2 }
 0x222   : > { %v1780_v19 = vrot.slane %v1779_v4, 1  ;;  %v1889_v43 = vmax.f32 %v1557_v63, %v3697_v36  ;;  %v1774_v32 = vmax.f32 %v1772_v6, %v1773_v45  ;;  %v1214_v62 = vcombine.high %v1070_v22, %v1070_v22 }
 0x223   : > { %v1787_v23 = vrot.slane %v1786_v24, 1  ;;  %v1891_v33 = vmax.f32 %v1571_v60, %v3708_v25  ;;  %v1793_v11 = vmax.f32 %v1791_v59, %v1792_v39  ;;  %v1221_v57 = vrot.slane %v1070_v22, %v3469_v29 }
 0x224   : > { %v1781_v20 = vmax.f32 %v1779_v4, %v1780_v19  ;;  %v1958_v2 = vsel %vm1944_vm13, %v1889_v43, %v1888_v27  ;;  %v1904_v52 = vmax.f32 %v1774_v32, %v3693_v26  ;;  %v1228_v61 = vrot.slane %v1214_v62, %v3469_v29 }
 0x225   : > { %v1788_v41 = vmax.f32 %v1786_v24, %v1787_v23  ;;  %v1959_v53 = vsel %vm1946_vm14, %v1890_v38, %v1958_v2  ;;  %v1794_v44 = vrot.slane %v1793_v11, 1  ;;  %v1229_v14 = vcombine.high %v1221_v57, %v1221_v57 }
 0x226   : > { %v1905_v36 = vmax.f32 %v1781_v20, %v3695_v17  ;;  %v1230_v25 = vcombine.high %v1228_v61, %v1228_v61  ;;  %v1628_v8 = vsel %vm1431_vm12, %v1221_v57, -inf  ;;  %v1642_v22 = vsel %vm1431_vm12, %v1228_v61, -inf }
 0x227   : > { %v1906_v49 = vmax.f32 %v1788_v41, %v3703_v42  ;;  %v1795_v48 = vmax.f32 %v1793_v11, %v1794_v44  ;;  %v1629_v9 = vrot.slane %v1628_v8, 4  ;;  %v1635_v26 = vsel %vm1431_vm12, %v1229_v14, -inf }
 0x228   : > { %v1972_v46 = vsel %vm1944_vm13, %v1905_v36, %v1904_v52  ;;  %v1636_v47 = vrot.slane %v1635_v26, 4  ;;  %v1643_v31 = vrot.slane %v1642_v22, 4  ;;  %v1649_v17 = vsel %vm1431_vm12, %v1230_v25, -inf }
 0x229   : > { %v1973_v15 = vsel %vm1946_vm14, %v1906_v49, %v1972_v46  ;;  %v1907_v55 = vmax.f32 %v1795_v48, %v3717_v37  ;;  %v1630_v42 = vmax.f32 %v1628_v8, %v1629_v9  ;;  %v1650_v50 = vrot.slane %v1649_v17, 4 }
 0x22a   : > { %v1078_v34 = vmax.f32 %v3715_v16, 0.0  ;;  %v1637_v12 = vmax.f32 %v1635_v26, %v1636_v47  ;;  %v1644_v3 = vmax.f32 %v1642_v22, %v1643_v31  ;;  %v1020_v40 = vadd.f32 %v2604_v18, %v3637_v56 }
 0x22b   : > { %v3753_v51 = vsel %vm1948_vm15, %v1891_v33, %v1959_v53  ;;  %v1631_v10 = vrot.slane %v1630_v42, 2  ;;  %v1651_v30 = vmax.f32 %v1649_v17, %v1650_v50  ;;  %v1052_v43 = vadd.f32 %v2604_v18, %v3631_v35 }
 0x22c   : > { %v1350_v13 = vcombine.high %v1078_v34, %v1078_v34  ;;  %v1357_v37 = vrot.slane %v1078_v34, %v3469_v29  ;;  %v1638_v1 = vrot.slane %v1637_v12, 2  ;;  %v1645_v21 = vrot.slane %v1644_v3, 2 }
 0x22d   : > { %v1068_v7 = vmax.f32 %v1020_v40, 0.0  ;;  %v1632_v16 = vmax.f32 %v1630_v42, %v1631_v10  ;;  %v1652_v6 = vrot.slane %v1651_v30, 2  ;;  %v3767_v53 = vsel %vm1948_vm15, %v1907_v55, %v1973_v15 }
 0x22e   : > { %v1364_v5 = vrot.slane %v1350_v13, %v3469_v29  ;;  %v1365_v0 = vcombine.high %v1357_v37, %v1357_v37  ;;  %v1852_v28 = vsel %vm1431_vm12, %v1357_v37, -inf  ;;  %v1639_v58 = vmax.f32 %v1637_v12, %v1638_v1 }
 0x22f   : > { %v1853_v54 = vrot.slane %v1852_v28, 4  ;;  %v1646_v4 = vmax.f32 %v1644_v3, %v1645_v21  ;;  %v1180_v27 = vcombine.high %v1068_v7, %v1068_v7  ;;  %v1633_v45 = vrot.slane %v1632_v16, 1 }
 0x230   : > { %v1366_v56 = vcombine.high %v1364_v5, %v1364_v5  ;;  %v1859_v59 = vsel %vm1431_vm12, %v1365_v0, -inf  ;;  %v1866_v63 = vsel %vm1431_vm12, %v1364_v5, -inf  ;;  %v1653_v38 = vmax.f32 %v1651_v30, %v1652_v6 }
 0x231   : > { %v1854_v24 = vmax.f32 %v1852_v28, %v1853_v54  ;;  %v1860_v60 = vrot.slane %v1859_v59, 4  ;;  %v1867_v19 = vrot.slane %v1866_v63, 4  ;;  %v1640_v32 = vrot.slane %v1639_v58, 1 }
 0x232   : > { %v1873_v39 = vsel %vm1431_vm12, %v1366_v56, -inf  ;;  %v1647_v20 = vrot.slane %v1646_v4, 1  ;;  %v1187_v57 = vrot.slane %v1068_v7, %v3469_v29  ;;  %v1194_v2 = vrot.slane %v1180_v27, %v3469_v29 }
 0x233   : > { %v1855_v23 = vrot.slane %v1854_v24, 2  ;;  %v1861_v62 = vmax.f32 %v1859_v59, %v1860_v60  ;;  %v1874_v33 = vrot.slane %v1873_v39, 4  ;;  %v1868_v11 = vmax.f32 %v1866_v63, %v1867_v19 }
 0x234   : > { %v3764_v41 = vmax.f32 %v1632_v16, %v1633_v45  ;;  %v1195_v36 = vcombine.high %v1187_v57, %v1187_v57  ;;  %v1196_v35 = vcombine.high %v1194_v2, %v1194_v2  ;;  %v1572_v14 = vsel %vm1431_vm12, %v1187_v57, -inf }
 0x235   : > { %v1862_v52 = vrot.slane %v1861_v62, 2  ;;  %v1875_v61 = vmax.f32 %v1873_v39, %v1874_v33  ;;  %v1869_v44 = vrot.slane %v1868_v11, 2  ;;  %v1654_v49 = vrot.slane %v1653_v38, 1 }
 0x236   : > { %v3770_v25 = vmax.f32 %v1854_v24, %v1855_v23  ;;  %v1573_v8 = vrot.slane %v1572_v14, 4  ;;  %v1076_v22 = vmax.f32 %v1052_v43, 0.0  ;;  %v1579_v46 = vsel %vm1431_vm12, %v1195_v36, -inf }
 0x237   : > { %v3772_v48 = vmax.f32 %v1861_v62, %v1862_v52  ;;  %v1586_v9 = vsel %vm1431_vm12, %v1194_v2, -inf  ;;  %v1593_v26 = vsel %vm1431_vm12, %v1196_v35, -inf  ;;  %v3777_v15 = vmax.f32 %v1639_v58, %v1640_v32 }
 0x238   : > { %v3779_v47 = vmax.f32 %v1646_v4, %v1647_v20  ;;  %v1876_v31 = vrot.slane %v1875_v61, 2  ;;  %v1574_v17 = vmax.f32 %v1572_v14, %v1573_v8  ;;  %v3781_v55 = vmax.f32 %v1868_v11, %v1869_v44 }
 0x239   : > { %v1580_v42 = vrot.slane %v1579_v46, 4  ;;  %v1587_v50 = vrot.slane %v1586_v9, 4  ;;  %v1594_v34 = vrot.slane %v1593_v26, 4  ;;  %v3783_v12 = vmax.f32 %v1653_v38, %v1654_v49 }
 0x23a   : > { %v1857_v3 = vrot.slane %v3770_v25, 1  ;;  %v1575_v18 = vrot.slane %v1574_v17, 2  ;;  %v1316_v40 = vcombine.high %v1076_v22, %v1076_v22  ;;  %v1864_v10 = vrot.slane %v3772_v48, 1 }
 0x23b   : > { %v1581_v30 = vmax.f32 %v1579_v46, %v1580_v42  ;;  %v1588_v13 = vmax.f32 %v1586_v9, %v1587_v50  ;;  %v1595_v37 = vmax.f32 %v1593_v26, %v1594_v34  ;;  %v1877_v1 = vmax.f32 %v1875_v61, %v1876_v31 }
 0x23c   : > { %v1576_v21 = vmax.f32 %v1574_v17, %v1575_v18  ;;  %v1323_v7 = vrot.slane %v1076_v22, %v3469_v29  ;;  %v1330_v16 = vrot.slane %v1316_v40, %v3469_v29  ;;  %v1871_v5 = vrot.slane %v3781_v55, 1 }
 0x23d   : > { %v1582_v0 = vrot.slane %v1581_v30, 2  ;;  %v1589_v6 = vrot.slane %v1588_v13, 2  ;;  %v1596_v28 = vrot.slane %v1595_v37, 2  ;;  %v1878_v22 = vrot.slane %v1877_v1, 1 }
 0x23e   : > { %v1577_v58 = vrot.slane %v1576_v21, 1  ;;  %v1331_v56 = vcombine.high %v1323_v7, %v1323_v7  ;;  %v1332_v54 = vcombine.high %v1330_v16, %v1330_v16  ;;  %v1796_v4 = vsel %vm1431_vm12, %v1323_v7, -inf }
 0x23f   : > { %v1583_v59 = vmax.f32 %v1581_v30, %v1582_v0  ;;  %v1590_v63 = vmax.f32 %v1588_v13, %v1589_v6  ;;  %v1597_v27 = vmax.f32 %v1595_v37, %v1596_v28  ;;  %v1797_v45 = vrot.slane %v1796_v4, 4 }
 0x240   : > { %v1578_v24 = vmax.f32 %v1576_v21, %v1577_v58  ;;  %v1803_v60 = vsel %vm1431_vm12, %v1331_v56, -inf  ;;  %v1810_v38 = vsel %vm1431_vm12, %v1330_v16, -inf  ;;  %v1817_v29 = vsel %vm1431_vm12, %v1332_v54, -inf }
 0x241   : > { %v1584_v19 = vrot.slane %v1583_v59, 1  ;;  %v1591_v39 = vrot.slane %v1590_v63, 1  ;;  %v1598_v43 = vrot.slane %v1597_v27, 1  ;;  %v1798_v32 = vmax.f32 %v1796_v4, %v1797_v45 }
 0x242   : > { %v1892_v23 = vmax.f32 %v1578_v24, %v3764_v41  ;;  %v1804_v62 = vrot.slane %v1803_v60, 4  ;;  %v1811_v33 = vrot.slane %v1810_v38, 4  ;;  %v1818_v20 = vrot.slane %v1817_v29, 4 }
 0x243   : > { %v1585_v11 = vmax.f32 %v1583_v59, %v1584_v19  ;;  %v1592_v57 = vmax.f32 %v1590_v63, %v1591_v39  ;;  %v1599_v2 = vmax.f32 %v1597_v27, %v1598_v43  ;;  %v1799_v52 = vrot.slane %v1798_v32, 2 }
 0x244   : > { %v1961_v61 = vsel %vm1950_vm0, %v1892_v23, %v3753_v51  ;;  %v1805_v44 = vmax.f32 %v1803_v60, %v1804_v62  ;;  %v1812_v36 = vmax.f32 %v1810_v38, %v1811_v33  ;;  %v1819_v35 = vmax.f32 %v1817_v29, %v1818_v20 }
 0x245   : > { %v1893_v14 = vmax.f32 %v1585_v11, %v3777_v15  ;;  %v1894_v49 = vmax.f32 %v1592_v57, %v3779_v47  ;;  %v1895_v41 = vmax.f32 %v1599_v2, %v3783_v12  ;;  %v1800_v8 = vmax.f32 %v1798_v32, %v1799_v52 }
 0x246   : > { %v1806_v46 = vrot.slane %v1805_v44, 2  ;;  %v1813_v9 = vrot.slane %v1812_v36, 2  ;;  %v1820_v26 = vrot.slane %v1819_v35, 2  ;;  %v1858_v31 = vmax.f32 %v3770_v25, %v1857_v3 }
 0x247   : > { %v1962_v17 = vsel %vm1952_vm1, %v1893_v14, %v1961_v61  ;;  %v1801_v51 = vrot.slane %v1800_v8, 1  ;;  %v1865_v34 = vmax.f32 %v3772_v48, %v1864_v10  ;;  %v1872_v12 = vmax.f32 %v3781_v55, %v1871_v5 }
 0x248   : > { %v1963_v42 = vsel %vm1954_vm2, %v1894_v49, %v1962_v17  ;;  %v1807_v15 = vmax.f32 %v1805_v44, %v1806_v46  ;;  %v1814_v50 = vmax.f32 %v1812_v36, %v1813_v9  ;;  %v1821_v47 = vmax.f32 %v1819_v35, %v1820_v26 }
 0x249   : > { %v1964_v18 = vsel %vm1956_vm3, %v1895_v41, %v1963_v42  ;;  %v1802_v40 = vmax.f32 %v1800_v8, %v1801_v51  ;;  %v1879_v25 = vmax.f32 %v1877_v1, %v1878_v22 }
 0x24a   : > { %v1808_v3 = vrot.slane %v1807_v15, 1  ;;  %v1815_v30 = vrot.slane %v1814_v50, 1  ;;  %v1822_v13 = vrot.slane %v1821_v47, 1  ;;  %1984 = vst [vmem:[%s3672_s5 + $0x8] sm:$0xff] %v1964_v18 }
 0x24b   : > { %v1908_v37 = vmax.f32 %v1802_v40, %v1858_v31 }
 0x24c   : > { %v1809_v21 = vmax.f32 %v1807_v15, %v1808_v3  ;;  %v1816_v7 = vmax.f32 %v1814_v50, %v1815_v30  ;;  %v1823_v16 = vmax.f32 %v1821_v47, %v1822_v13 }
 0x24d   : > { %v1975_v48 = vsel %vm1950_vm0, %v1908_v37, %v3767_v53 }
 0x24e   : > { %v1909_v55 = vmax.f32 %v1809_v21, %v1865_v34  ;;  %v1910_v10 = vmax.f32 %v1816_v7, %v1872_v12  ;;  %v1911_v1 = vmax.f32 %v1823_v16, %v1879_v25 }
 0x250   : > { %v1976_v5 = vsel %vm1952_vm1, %v1909_v55, %v1975_v48 }
 0x251   : > { %v1977_v0 = vsel %vm1954_vm2, %v1910_v10, %v1976_v5 }
 0x252   : > { %v1978_v53 = vsel %vm1956_vm3, %v1911_v1, %v1977_v0 }
 0x253   : > { %1986 = vst [vmem:[%s3672_s5 + $0x18] sm:$0xff] %v1978_v53 }
 0x254   : > { %2618 = shalt.err (!%p2615_p6)
}
 0x255   : > { %s2619_s21 = scalar_lea.hbm %s3816_s28, 512  ;;  %s2623_s4 = scalar_lea.hbm %s3880_s3, 16384 }
 0x256   : > { %p2620_p7 = scmp.ne.s32.totalorder %s3816_s28, %s2619_s21  ;;  %p2624_p11 = scmp.lt.u32.totalorder %s3816_s28, %s3880_s3 }
 0x257   : > { %p2625_p12 = scmp.lt.u32.totalorder %s2623_s4, %s2619_s21  ;;  %p2627_p0 = scmp.lt.u32.totalorder %s2619_s21, %s3816_s28 }
 0x258   : > { %p2621_p9 = pnand %p2620_p7, %p2784_p3 }
 0x259   : > { %p2626_p13 = por %p2625_p12, %p2624_p11 }
 0x25a   : > { %p2622_p10 = pneg %p2621_p9 }
 0x25b   : > { %p2628_p1 = por %p2627_p0, %p2626_p13 }
 0x25d   : > { %p2629_p2 = pnand %p2628_p1, %p2622_p10 }
 0x25f   : > { %2632 = shalt.err (!%p2629_p2)
}
 0x260   : > { %s2711_s16 = smov 128   ;;  %s2712_s8 = smov 8  }
 0x261   : > { %2194 = dma.vmem_to_hbm [thread:$0]  (%p2784_p3), %s3818_s7, 512, %s3816_s28, %s3825_s29, %s2711_s16, %s2711_s16, %s2712_s8  }
 0x262 PF: > { %p2200_p4 = scmp.ge.s32.totalorder %s2699_s19, 2  ;;  %s2018_s9 = sand.u32 1, %s2671_s12  }
 0x263   : > { %s2019_s11 = scalar_lea.sflag [#allocation3], %s2018_s9 }
 0x264   : > { %p2197_p5 = pnand %p2200_p4, %p2793_p8 }
 0x266   : > { %2666 = dma.done.wait (!%p2197_p5), %s2019_s11, 512  }
 0x267   : > { %2668 = vsyncadd (!%p2197_p5), %s2019_s11, 4294966784  ;;  %s16_s19 = sadd.s32 1, %s2699_s19   ;;  %s3885_s12 = smov %s2675_s13 }
 0x268   : > { %p13_p6 = scmp.ge.s32.totalorder %s16_s19, 34   ;;  %s3886_s13 = smov %s2679_s14 }
 0x269   : > { %s3887_s14 = smov %s2802_s30  ;;  %s3888_s15 = smov %s2691_s17 }
 0x26a   : > { %s3889_s16 = smov %s2695_s18  ;;  %s3890_s17 = smov %s3893_s22 }
 0x26b   : > { %s3891_s18 = smov %s3897_s23  ;;  %15 = sbr.rel (!%p13_p6) target bundleno = 5 (0x5), region = 68 }
 0x272   :  { %2024 = vsyncpa [#allocation3], 1 }
 0x273   :  { %2026 = vsyncpa [#allocation3 + $0x1], 1 }

</bundles_post_ra>
